<compile_context>
chip_gen: v5e
topology: v5e:2x2
jax: 0.10.0
libtpu: 0.0.40
codegen_flags: <defaults>
</compile_context>

<pallas_src>
import functools

import numpy as np
import jax
import jax.numpy as jnp
from jax.experimental import pallas as pl
from jax.experimental.pallas import tpu as pltpu

ELEM_LIST_LEN = 23
ATOM_FDIM = ELEM_LIST_LEN + 6 + 5 + 4 + 1   # 39
BOND_FDIM = 5 + 6                           # 11
BOND_IN = ATOM_FDIM + BOND_FDIM             # 50
MAX_NB = 6                                  # neighbor columns in agraph/bgraph

MAX_A = 16                                  # padded atoms per molecule
MAX_B = 16                                  # padded bonds per molecule
MOLS_PER_BLOCK = 16                         # 16 * 16 = 256 rows per grid step


def mpnn_block_kernel(fatoms_ref, fbonds_ref, bg_adj_ref, ag_adj_ref, pool_ref,
                      w_i_ref, w_h_ref, w_oa_ref, w_om_ref, b_o_ref,
                      out_ref, *, depth):
    """Forward for one block of MOLS_PER_BLOCK (padded) molecules.

    All padding / masking / per-molecule mean is baked into the host-built
    block-diagonal adjacency and pooling matrices, so the kernel is just
    MXU matmuls + ReLUs.
    """
    # binput = W_i(fbonds); padded bond rows have zero features -> zero rows.
    binput = jnp.dot(fbonds_ref[...], w_i_ref[...],
                     preferred_element_type=jnp.float32)          # (RB, H)
    message = jnp.maximum(binput, 0.0)

    # Adjacency arrives as bf16 (exact small integers); upcast once.
    bg_adj = bg_adj_ref[...].astype(jnp.float32)                  # (RB, RB)
    w_h = w_h_ref[...]                                            # load once

    # message passing: index_select_ND(message,0,bgraph).sum(1) == bg_adj @ message
    for _ in range(depth - 1):                                    # static unroll
        nei = jnp.dot(bg_adj, message, preferred_element_type=jnp.float32)
        nei = jnp.dot(nei, w_h, preferred_element_type=jnp.float32)
        message = jnp.maximum(binput + nei, 0.0)

    # atom-side neighbor sum: index_select_ND(message,0,agraph).sum(1)
    nei_a = jnp.dot(ag_adj_ref[...].astype(jnp.float32), message,
                    preferred_element_type=jnp.float32)           # (RA, H)

    # ainput = cat([fatoms, nei_a], 1); W_o split into atom / message halves.
    hid = (jnp.dot(fatoms_ref[...], w_oa_ref[...], preferred_element_type=jnp.float32)
           + jnp.dot(nei_a, w_om_ref[...], preferred_element_type=jnp.float32)
           + b_o_ref[...])
    atom_hiddens = jnp.maximum(hid, 0.0)                          # (RA, H)

    # mean over real atoms per molecule: pool rows hold valid_mask / n_a
    # (all-zero for padded / zero-atom molecules), so this single matmul does
    # mask + sum + divide on the MXU and writes a dense (B, H) slab.
    out_ref[...] = jnp.dot(pool_ref[...], atom_hiddens,
                           preferred_element_type=jnp.float32)    # (B, H)


@functools.partial(jax.jit, static_argnames=("depth", "mols_per_block"))
def mpnn_blocks_call(fatoms_blk, fbonds_blk, bg_adj_blk, ag_adj_blk, pool_blk,
                     w_i, w_h, w_oa, w_om, b_o, *, depth, mols_per_block):
    hidden = w_i.shape[1]
    ra = mols_per_block * MAX_A
    rb = mols_per_block * MAX_B
    n_blocks = pool_blk.shape[0] // mols_per_block

    def resident(shape):
        # Constant index_map: weight is DMA'd once, stays in VMEM across grid.
        return pl.BlockSpec(shape, lambda i: (0, 0))

    return pl.pallas_call(
        functools.partial(mpnn_block_kernel, depth=depth),
        out_shape=jax.ShapeDtypeStruct((n_blocks * mols_per_block, hidden),
                                       jnp.float32),
        grid_spec=pltpu.PrefetchScalarGridSpec(
            num_scalar_prefetch=0,
            grid=(n_blocks,),
            in_specs=[
                pl.BlockSpec((ra, ATOM_FDIM), lambda i: (i, 0)),       # fatoms
                pl.BlockSpec((rb, BOND_IN), lambda i: (i, 0)),         # fbonds
                pl.BlockSpec((rb, rb), lambda i: (i, 0)),              # bg_adj (bf16)
                pl.BlockSpec((ra, rb), lambda i: (i, 0)),              # ag_adj (bf16)
                pl.BlockSpec((mols_per_block, ra), lambda i: (i, 0)),  # pool
                resident(w_i.shape), resident(w_h.shape), resident(w_oa.shape),
                resident(w_om.shape), resident(b_o.shape),
            ],
            out_specs=pl.BlockSpec((mols_per_block, hidden), lambda i: (i, 0)),
        ),
        compiler_params=pltpu.CompilerParams(
            dimension_semantics=("parallel",)),
    )(fatoms_blk, fbonds_blk, bg_adj_blk, ag_adj_blk, pool_blk,
      w_i, w_h, w_oa, w_om, b_o)


def _build_blocks(fatoms, fbonds, agraph, bgraph, atoms_bonds, mols_per_block):
    """Host-side (numpy, once per batch): pad, stack, and build block-diagonal
    one-hot adjacency + pooling matrices. Mirrors MPNN.forward's host reads
    of atoms_bonds (.item() per molecule)."""
    fatoms = np.asarray(jax.device_get(fatoms), np.float32)
    fbonds = np.asarray(jax.device_get(fbonds), np.float32)
    agraph = np.asarray(jax.device_get(agraph), np.int64)
    bgraph = np.asarray(jax.device_get(bgraph), np.int64)
    ab = np.asarray(jax.device_get(atoms_bonds), np.int64)

    n_mols = int(ab.shape[0])
    n_blocks = max(1, -(-n_mols // mols_per_block))
    n_pad = n_blocks * mols_per_block
    ra, rb = mols_per_block * MAX_A, mols_per_block * MAX_B

    fatoms_blk = np.zeros((n_blocks * ra, ATOM_FDIM), np.float32)
    fbonds_blk = np.zeros((n_blocks * rb, BOND_IN), np.float32)
    bg_adj_blk = np.zeros((n_blocks * rb, rb), np.float32)
    ag_adj_blk = np.zeros((n_blocks * ra, rb), np.float32)
    pool_blk = np.zeros((n_pad, ra), np.float32)

    N_atoms, N_bonds = 0, 0
    for m in range(n_mols):
        n_a, n_b = int(ab[m, 0]), int(ab[m, 1])
        if n_a == 0:
            # zero pool row -> zero embedding (matches torch.zeros(1, hidden))
            continue
        b, s = divmod(m, mols_per_block)
        a0 = b * ra + s * MAX_A            # stacked atom-row offset
        b0 = b * rb + s * MAX_B            # stacked bond-row offset

        fatoms_blk[a0:a0 + n_a] = fatoms[N_atoms:N_atoms + n_a]
        fbonds_blk[b0:b0 + n_b] = fbonds[N_bonds:N_bonds + n_b]

        if n_b > 0:
            # bond->bond one-hot adjacency (same semantics as the reference
            # gather: padded neighbor slots count toward local bond 0).
            bg = bgraph[N_bonds:N_bonds + n_b]                   # (n_b, MAX_NB)
            rows = np.repeat(np.arange(n_b), bg.shape[1])
            np.add.at(bg_adj_blk,
                      (b0 + rows, s * MAX_B + bg.reshape(-1)), 1.0)
            # atom->bond one-hot adjacency
            ag = agraph[N_atoms:N_atoms + n_a]                   # (n_a, MAX_NB)
            rows = np.repeat(np.arange(n_a), ag.shape[1])
            np.add.at(ag_adj_blk,
                      (a0 + rows, s * MAX_B + ag.reshape(-1)), 1.0)

        pool_blk[m, s * MAX_A:s * MAX_A + n_a] = 1.0 / n_a       # mask + mean

        N_atoms += n_a
        N_bonds += n_b

    # Adjacency entries are small exact integers -> bf16 is lossless and
    # halves the dominant HBM stream into the kernel.
    return (jnp.asarray(fatoms_blk), jnp.asarray(fbonds_blk),
            jnp.asarray(bg_adj_blk, dtype=jnp.bfloat16),
            jnp.asarray(ag_adj_blk, dtype=jnp.bfloat16),
            jnp.asarray(pool_blk), n_mols)


def mpnn_forward(feature, params, depth, mols_per_block=MOLS_PER_BLOCK):
    """Batched forward identical to MPNN.forward (one pallas_call per batch)."""
    fatoms, fbonds, agraph, bgraph, atoms_bonds = feature
    w_i, w_h, w_oa, w_om, b_o = params
    (fatoms_blk, fbonds_blk, bg_adj_blk, ag_adj_blk,
     pool_blk, n_mols) = _build_blocks(fatoms, fbonds, agraph, bgraph,
                                       atoms_bonds, mols_per_block)
    out = mpnn_blocks_call(fatoms_blk, fbonds_blk, bg_adj_blk, ag_adj_blk,
                           pool_blk, w_i, w_h, w_oa, w_om, b_o,
                           depth=depth, mols_per_block=mols_per_block)
    return out[:n_mols]


def mpnn_single_ref(fatoms, fbonds, agraph, bgraph, w_i, w_h, w_oa, w_om, b_o, depth):
    """Pure-JAX reference of single_molecule_forward (for correctness check)."""
    binput = fbonds @ w_i
    message = jnp.maximum(binput, 0.0)
    for _ in range(depth - 1):
        nei = message[bgraph].sum(axis=1)
        message = jnp.maximum(binput + nei @ w_h, 0.0)
    nei = message[agraph].sum(axis=1)
    hid = fatoms @ w_oa + nei @ w_om + b_o
    return jnp.maximum(hid, 0.0).mean(axis=0, keepdims=True)


if __name__ == "__main__":
    depth, hidden = 3, 32
    n_as = [6, 5, 9]        # atoms per molecule
    n_bs = [8, 7, 12]       # bonds per molecule

    key = jax.random.PRNGKey(0)
    keys = jax.random.split(key, 16)

    # Deterministic parameters (torch nn.Linear weights, stored transposed so
    # forward is x @ W; W_o split into its atom-feature / message halves).
    w_i = 0.1 * jax.random.normal(keys[0], (BOND_IN, hidden), jnp.float32)
    w_h = 0.1 * jax.random.normal(keys[1], (hidden, hidden), jnp.float32)
    w_oa = 0.1 * jax.random.normal(keys[2], (ATOM_FDIM, hidden), jnp.float32)
    w_om = 0.1 * jax.random.normal(keys[3], (hidden, hidden), jnp.float32)
    b_o = 0.1 * jax.random.normal(keys[4], (1, hidden), jnp.float32)
    params = (w_i, w_h, w_oa, w_om, b_o)

    # Synthetic batched graph features (concatenated across molecules).
    fatoms = jax.random.normal(keys[5], (sum(n_as), ATOM_FDIM), jnp.float32)
    fbonds = jax.random.normal(keys[6], (sum(n_bs), BOND_IN), jnp.float32)
    ag_list, bg_list = [], []
    for i, (na, nb) in enumerate(zip(n_as, n_bs)):
        ag_list.append(jax.random.randint(keys[7 + 2 * i], (na, MAX_NB), 0, nb, jnp.int32))
        bg_list.append(jax.random.randint(keys[8 + 2 * i], (nb, MAX_NB), 0, nb, jnp.int32))
    agraph = jnp.concatenate(ag_list, axis=0)
    bgraph = jnp.concatenate(bg_list, axis=0)
    atoms_bonds = jnp.array(list(zip(n_as, n_bs)), jnp.int32)

    feature = (fatoms, fbonds, agraph, bgraph, atoms_bonds)
    out = jax.block_until_ready(mpnn_forward(feature, params, depth))

    # Reference check against pure JAX (per-molecule, exactly like the module).
    refs, Na, Nb = [], 0, 0
    for na, nb in zip(n_as, n_bs):
        refs.append(mpnn_single_ref(fatoms[Na:Na + na], fbonds[Nb:Nb + nb],
                                    agraph[Na:Na + na], bgraph[Nb:Nb + nb],
                                    w_i, w_h, w_oa, w_om, b_o, depth))
        Na += na
        Nb += nb
    ref = jnp.concatenate(refs, axis=0)

    assert out.shape == (len(n_as), hidden)
    assert jnp.allclose(out, ref, rtol=2e-2, atol=2e-2), (out, ref)
    print("KERNEL_OK")
</pallas_src>

<mosaic_0001>
module attributes {stable_mosaic.version = 11 : i64} {
  func.func @mpnn_block_kernel(%arg0: i32, %arg1: memref<256x39xf32, #tpu.memory_space<vmem>>, %arg2: memref<256x50xf32, #tpu.memory_space<vmem>>, %arg3: memref<256x256xbf16, #tpu.memory_space<vmem>>, %arg4: memref<256x256xbf16, #tpu.memory_space<vmem>>, %arg5: memref<16x256xf32, #tpu.memory_space<vmem>>, %arg6: memref<50x32xf32, #tpu.memory_space<vmem>>, %arg7: memref<32x32xf32, #tpu.memory_space<vmem>>, %arg8: memref<39x32xf32, #tpu.memory_space<vmem>>, %arg9: memref<32x32xf32, #tpu.memory_space<vmem>>, %arg10: memref<1x32xf32, #tpu.memory_space<vmem>>, %arg11: memref<16x32xf32, #tpu.memory_space<vmem>>) attributes {dimension_semantics = [#tpu.dimension_semantics<parallel>], iteration_bounds = array<i64: 1>, scalar_prefetch = 0 : i64, scratch_operands = 0 : i64, tpu.core_type = #tpu.core_type<tc>, window_params = [{transform_indices = @transform_0, window_bounds = array<i64: 256, 39>}, {transform_indices = @transform_1, window_bounds = array<i64: 256, 50>}, {transform_indices = @transform_2, window_bounds = array<i64: 256, 256>}, {transform_indices = @transform_3, window_bounds = array<i64: 256, 256>}, {transform_indices = @transform_4, window_bounds = array<i64: 16, 256>}, {pipeline_mode = #tpu.pipeline_mode<synchronous>, transform_indices = @transform_5, window_bounds = array<i64: 50, 32>}, {pipeline_mode = #tpu.pipeline_mode<synchronous>, transform_indices = @transform_6, window_bounds = array<i64: 32, 32>}, {pipeline_mode = #tpu.pipeline_mode<synchronous>, transform_indices = @transform_7, window_bounds = array<i64: 39, 32>}, {pipeline_mode = #tpu.pipeline_mode<synchronous>, transform_indices = @transform_8, window_bounds = array<i64: 32, 32>}, {pipeline_mode = #tpu.pipeline_mode<synchronous>, transform_indices = @transform_9, window_bounds = array<i64: 1, 32>}, {transform_indices = @transform_10, window_bounds = array<i64: 16, 32>}]} {
    %c0 = arith.constant 0 : index
    %c0_0 = arith.constant 0 : index
    %0 = vector.load %arg2[%c0, %c0_0] : memref<256x50xf32, #tpu.memory_space<vmem>>, vector<256x50xf32>
    %c0_1 = arith.constant 0 : index
    %c0_2 = arith.constant 0 : index
    %1 = vector.load %arg6[%c0_1, %c0_2] : memref<50x32xf32, #tpu.memory_space<vmem>>, vector<50x32xf32>
    %cst = arith.constant dense<0.000000e+00> : vector<256x32xf32>
    %2 = tpu.matmul %0, %1, %cst {dimension_numbers = #tpu.dot_dimension_numbers<[1], [0], [0], [1], [0, 0, 1, 1], [], []>} : vector<256x50xf32>, vector<50x32xf32>, vector<256x32xf32> -> vector<256x32xf32>
    %cst_3 = arith.constant 0.000000e+00 : f32
    %3 = vector.broadcast %cst_3 : f32 to vector<256x32xf32>
    %4 = arith.maximumf %2, %3 : vector<256x32xf32>
    %c0_4 = arith.constant 0 : index
    %c0_5 = arith.constant 0 : index
    %5 = vector.load %arg3[%c0_4, %c0_5] : memref<256x256xbf16, #tpu.memory_space<vmem>>, vector<256x256xbf16>
    %6 = arith.extf %5 : vector<256x256xbf16> to vector<256x256xf32>
    %c0_6 = arith.constant 0 : index
    %c0_7 = arith.constant 0 : index
    %7 = vector.load %arg7[%c0_6, %c0_7] : memref<32x32xf32, #tpu.memory_space<vmem>>, vector<32x32xf32>
    %cst_8 = arith.constant dense<0.000000e+00> : vector<256x32xf32>
    %8 = tpu.matmul %6, %4, %cst_8 {dimension_numbers = #tpu.dot_dimension_numbers<[1], [0], [0], [1], [0, 0, 1, 1], [], []>} : vector<256x256xf32>, vector<256x32xf32>, vector<256x32xf32> -> vector<256x32xf32>
    %cst_9 = arith.constant dense<0.000000e+00> : vector<256x32xf32>
    %9 = tpu.matmul %8, %7, %cst_9 {dimension_numbers = #tpu.dot_dimension_numbers<[1], [0], [0], [1], [0, 0, 1, 1], [], []>} : vector<256x32xf32>, vector<32x32xf32>, vector<256x32xf32> -> vector<256x32xf32>
    %10 = arith.addf %2, %9 : vector<256x32xf32>
    %cst_10 = arith.constant 0.000000e+00 : f32
    %11 = vector.broadcast %cst_10 : f32 to vector<256x32xf32>
    %12 = arith.maximumf %10, %11 : vector<256x32xf32>
    %cst_11 = arith.constant dense<0.000000e+00> : vector<256x32xf32>
    %13 = tpu.matmul %6, %12, %cst_11 {dimension_numbers = #tpu.dot_dimension_numbers<[1], [0], [0], [1], [0, 0, 1, 1], [], []>} : vector<256x256xf32>, vector<256x32xf32>, vector<256x32xf32> -> vector<256x32xf32>
    %cst_12 = arith.constant dense<0.000000e+00> : vector<256x32xf32>
    %14 = tpu.matmul %13, %7, %cst_12 {dimension_numbers = #tpu.dot_dimension_numbers<[1], [0], [0], [1], [0, 0, 1, 1], [], []>} : vector<256x32xf32>, vector<32x32xf32>, vector<256x32xf32> -> vector<256x32xf32>
    %15 = arith.addf %2, %14 : vector<256x32xf32>
    %cst_13 = arith.constant 0.000000e+00 : f32
    %16 = vector.broadcast %cst_13 : f32 to vector<256x32xf32>
    %17 = arith.maximumf %15, %16 : vector<256x32xf32>
    %c0_14 = arith.constant 0 : index
    %c0_15 = arith.constant 0 : index
    %18 = vector.load %arg4[%c0_14, %c0_15] : memref<256x256xbf16, #tpu.memory_space<vmem>>, vector<256x256xbf16>
    %19 = arith.extf %18 : vector<256x256xbf16> to vector<256x256xf32>
    %cst_16 = arith.constant dense<0.000000e+00> : vector<256x32xf32>
    %20 = tpu.matmul %19, %17, %cst_16 {dimension_numbers = #tpu.dot_dimension_numbers<[1], [0], [0], [1], [0, 0, 1, 1], [], []>} : vector<256x256xf32>, vector<256x32xf32>, vector<256x32xf32> -> vector<256x32xf32>
    %c0_17 = arith.constant 0 : index
    %c0_18 = arith.constant 0 : index
    %21 = vector.load %arg1[%c0_17, %c0_18] : memref<256x39xf32, #tpu.memory_space<vmem>>, vector<256x39xf32>
    %c0_19 = arith.constant 0 : index
    %c0_20 = arith.constant 0 : index
    %22 = vector.load %arg8[%c0_19, %c0_20] : memref<39x32xf32, #tpu.memory_space<vmem>>, vector<39x32xf32>
    %cst_21 = arith.constant dense<0.000000e+00> : vector<256x32xf32>
    %23 = tpu.matmul %21, %22, %cst_21 {dimension_numbers = #tpu.dot_dimension_numbers<[1], [0], [0], [1], [0, 0, 1, 1], [], []>} : vector<256x39xf32>, vector<39x32xf32>, vector<256x32xf32> -> vector<256x32xf32>
    %c0_22 = arith.constant 0 : index
    %c0_23 = arith.constant 0 : index
    %24 = vector.load %arg9[%c0_22, %c0_23] : memref<32x32xf32, #tpu.memory_space<vmem>>, vector<32x32xf32>
    %cst_24 = arith.constant dense<0.000000e+00> : vector<256x32xf32>
    %25 = tpu.matmul %20, %24, %cst_24 {dimension_numbers = #tpu.dot_dimension_numbers<[1], [0], [0], [1], [0, 0, 1, 1], [], []>} : vector<256x32xf32>, vector<32x32xf32>, vector<256x32xf32> -> vector<256x32xf32>
    %26 = arith.addf %23, %25 : vector<256x32xf32>
    %c0_25 = arith.constant 0 : index
    %c0_26 = arith.constant 0 : index
    %27 = vector.load %arg10[%c0_25, %c0_26] : memref<1x32xf32, #tpu.memory_space<vmem>>, vector<1x32xf32>
    %28 = vector.broadcast %27 : vector<1x32xf32> to vector<256x32xf32>
    %29 = arith.addf %26, %28 : vector<256x32xf32>
    %cst_27 = arith.constant 0.000000e+00 : f32
    %30 = vector.broadcast %cst_27 : f32 to vector<256x32xf32>
    %31 = arith.maximumf %29, %30 : vector<256x32xf32>
    %c0_28 = arith.constant 0 : index
    %c0_29 = arith.constant 0 : index
    %32 = vector.load %arg5[%c0_28, %c0_29] : memref<16x256xf32, #tpu.memory_space<vmem>>, vector<16x256xf32>
    %cst_30 = arith.constant dense<0.000000e+00> : vector<16x32xf32>
    %33 = tpu.matmul %32, %31, %cst_30 {dimension_numbers = #tpu.dot_dimension_numbers<[1], [0], [0], [1], [0, 0, 1, 1], [], []>} : vector<16x256xf32>, vector<256x32xf32>, vector<16x32xf32> -> vector<16x32xf32>
    %c0_31 = arith.constant 0 : index
    %c0_32 = arith.constant 0 : index
    %34 = vector.load %arg11[%c0_31, %c0_32] : memref<16x32xf32, #tpu.memory_space<vmem>>, vector<16x32xf32>
    tpu.vector_store %arg11[%c0_31, %c0_32], %33 {strides = array<i32>} : memref<16x32xf32, #tpu.memory_space<vmem>>, vector<16x32xf32>,
    return
  }
  func.func @transform_0(%arg0: i32) -> (i32, i32) {
    %c0_i32 = arith.constant 0 : i32
    %c0_i32_0 = arith.constant 0 : i32
    return %arg0, %c0_i32 : i32, i32
  }
  func.func @transform_1(%arg0: i32) -> (i32, i32) {
    %c0_i32 = arith.constant 0 : i32
    %c0_i32_0 = arith.constant 0 : i32
    return %arg0, %c0_i32 : i32, i32
  }
  func.func @transform_2(%arg0: i32) -> (i32, i32) {
    %c0_i32 = arith.constant 0 : i32
    %c0_i32_0 = arith.constant 0 : i32
    return %arg0, %c0_i32 : i32, i32
  }
  func.func @transform_3(%arg0: i32) -> (i32, i32) {
    %c0_i32 = arith.constant 0 : i32
    %c0_i32_0 = arith.constant 0 : i32
    return %arg0, %c0_i32 : i32, i32
  }
  func.func @transform_4(%arg0: i32) -> (i32, i32) {
    %c0_i32 = arith.constant 0 : i32
    %c0_i32_0 = arith.constant 0 : i32
    return %arg0, %c0_i32 : i32, i32
  }
  func.func @transform_5(%arg0: i32) -> (i32, i32) {
    %c0_i32 = arith.constant 0 : i32
    %c0_i32_0 = arith.constant 0 : i32
    %c0_i32_1 = arith.constant 0 : i32
    return %c0_i32, %c0_i32_0 : i32, i32
  }
  func.func @transform_6(%arg0: i32) -> (i32, i32) {
    %c0_i32 = arith.constant 0 : i32
    %c0_i32_0 = arith.constant 0 : i32
    %c0_i32_1 = arith.constant 0 : i32
    return %c0_i32, %c0_i32_0 : i32, i32
  }
  func.func @transform_7(%arg0: i32) -> (i32, i32) {
    %c0_i32 = arith.constant 0 : i32
    %c0_i32_0 = arith.constant 0 : i32
    %c0_i32_1 = arith.constant 0 : i32
    return %c0_i32, %c0_i32_0 : i32, i32
  }
  func.func @transform_8(%arg0: i32) -> (i32, i32) {
    %c0_i32 = arith.constant 0 : i32
    %c0_i32_0 = arith.constant 0 : i32
    %c0_i32_1 = arith.constant 0 : i32
    return %c0_i32, %c0_i32_0 : i32, i32
  }
  func.func @transform_9(%arg0: i32) -> (i32, i32) {
    %c0_i32 = arith.constant 0 : i32
    %c0_i32_0 = arith.constant 0 : i32
    %c0_i32_1 = arith.constant 0 : i32
    return %c0_i32, %c0_i32_0 : i32, i32
  }
  func.func @transform_10(%arg0: i32) -> (i32, i32) {
    %c0_i32 = arith.constant 0 : i32
    %c0_i32_0 = arith.constant 0 : i32
    return %arg0, %c0_i32 : i32, i32
  }
}

</mosaic_0001>

<bundles_post_ra>
// kernel: mpnn_blocks_call.1
= control target key start
LH: loop header
LB: loop body
LE: loop exit
PB: predicated region body
PF: predicated region fallthrough
CT: control target
= control target key end

     0   :  { %vm172_vm0 = vcmask 1041408   ;;  %s3994_s0 = inlined_call_operand.vmem [shape: f32[256,39], index: 0, kind: input, shape index: {}]   ;;  %s3995_s1 = inlined_call_operand.vmem [shape: f32[256,50], index: 1, kind: input, shape index: {}]   ;;  %s3996_s2 = inlined_call_operand.vmem [shape: bf16[256,256], index: 2, kind: input, shape index: {}]   ;;  %s3997_s3 = inlined_call_operand.vmem [shape: bf16[256,256], index: 3, kind: input, shape index: {}]   ;;  %s3998_s4 = inlined_call_operand.vmem [shape: f32[16,256], index: 4, kind: input, shape index: {}]   ;;  %s3999_s5 = inlined_call_operand.vmem [shape: f32[50,32], index: 5, kind: input, shape index: {}]   ;;  %s4000_s6 = inlined_call_operand.vmem [shape: f32[32,32], index: 6, kind: input, shape index: {}]   ;;  %s4001_s7 = inlined_call_operand.vmem [shape: f32[39,32], index: 7, kind: input, shape index: {}]   ;;  %s4002_s8 = inlined_call_operand.vmem [shape: f32[32,32], index: 8, kind: input, shape index: {}]   ;;  %s4003_s9 = inlined_call_operand.vmem [shape: f32[1,32], index: 9, kind: input, shape index: {}]   ;;  %s4004_s10 = inlined_call_operand.hbm [shape: f32[16,32], index: 10, kind: output, shape index: {}]  }
   0x1   :  { %v74_v0 = vld [vmem:[%s3999_s5 + $0x30] sm:$0x3]  ;;  %v73_v1 = vld [vmem:[%s3999_s5 + $0x28] sm:$0xff]  ;;  %v72_v2 = vld [vmem:[%s3999_s5 + $0x20] sm:$0xff] }
   0x2   :  { %2344 = vmatpush.msk.msra.mxu0 %vm172_vm0, %v74_v0  ;;  %2506 = vmatpush.msk.msra.mxu2 %vm172_vm0, %v74_v0  ;;  %v71_v3 = vld [vmem:[%s3999_s5 + $0x18] sm:$0xff] }
   0x4   :  { %186 = vmatpush.msra.mxu0 %v73_v1  ;;  %2507 = vmatpush.msra.mxu2 %v73_v1 }
   0x5   :  { %15 = vsyncpa [#allocation3], 0  ;;  %v70_v4 = vld [vmem:[%s3999_s5 + $0x10] sm:$0xff]  ;;  %v69_v5 = vld [vmem:[%s3999_s5 + $0x8] sm:$0xff]  ;;  %vm75_vm1 = vcmask 408576   ;;  %vm647_vm2 = vcmask 261120  }
   0x6   :  { %187 = vmatpush.msra.mxu0 %v72_v2  ;;  %2508 = vmatpush.msra.mxu2 %v72_v2  ;;  %v68_v6 = vld [vmem:[%s3999_s5] sm:$0xff]  ;;  %v37_v8 = vld [vmem:[%s3995_s1 + $0x8] sm:$0xff]  ;;  %v38_v9 = vld [vmem:[%s3995_s1 + $0x10] sm:$0xff]  ;;  %vm2089_vm3 = vcmask 1046528   ;;  %vm1992_vm4 = vcmask 318464   ;;  %s2332_s14 = sshll.u32 %s4004_s10, 4  ;;  %s2333_s14 = int_to_ptr.hbm [resolvable:$true] %s2332_s14 }
   0x7   :  { %v36_v7 = vld [vmem:[%s3995_s1] sm:$0xff]  ;;  %v39_v10 = vld [vmem:[%s3995_s1 + $0x18] sm:$0xff]  ;;  %v41_v12 = vld [vmem:[%s3995_s1 + $0x28] sm:$0xff]  ;;  %s2565_s15 = smov 8  }
   0x8   :  { %188 = vmatpush.msra.mxu0 %v71_v3  ;;  %2509 = vmatpush.msra.mxu2 %v71_v3  ;;  %v40_v11 = vld [vmem:[%s3995_s1 + $0x20] sm:$0xff]  ;;  %v42_v13 = vld [vmem:[%s3995_s1 + $0x30] sm:$0xff]  ;;  %v43_v14 = vld [vmem:[%s3995_s1 + $0x38] sm:$0xff] }
   0x9   :  { %v44_v15 = vld [vmem:[%s3995_s1 + $0x40] sm:$0xff]  ;;  %v45_v16 = vld [vmem:[%s3995_s1 + $0x48] sm:$0xff]  ;;  %v62_v17 = vld [vmem:[%s3995_s1 + $0xd0] sm:$0xff] }
   0xa   :  { %189 = vmatpush.msra.mxu0 %v70_v4  ;;  %2510 = vmatpush.msra.mxu2 %v70_v4  ;;  %v46_v18 = vld [vmem:[%s3995_s1 + $0x50] sm:$0xff]  ;;  %v63_v19 = vld [vmem:[%s3995_s1 + $0xd8] sm:$0xff]  ;;  %v64_v21 = vld [vmem:[%s3995_s1 + $0xe0] sm:$0xff] }
   0xb   :  { %v47_v20 = vld [vmem:[%s3995_s1 + $0x58] sm:$0xff]  ;;  %v48_v22 = vld [vmem:[%s3995_s1 + $0x60] sm:$0xff]  ;;  %v65_v23 = vld [vmem:[%s3995_s1 + $0xe8] sm:$0xff] }
   0xc   :  { %190 = vmatpush.msra.mxu0 %v69_v5  ;;  %2511 = vmatpush.msra.mxu2 %v69_v5  ;;  %v49_v24 = vld [vmem:[%s3995_s1 + $0x68] sm:$0xff]  ;;  %v66_v25 = vld [vmem:[%s3995_s1 + $0xf0] sm:$0xff]  ;;  %v67_v27 = vld [vmem:[%s3995_s1 + $0xf8] sm:$0xff] }
   0xd   :  { %v50_v26 = vld [vmem:[%s3995_s1 + $0x70] sm:$0xff]  ;;  %v51_v28 = vld [vmem:[%s3995_s1 + $0x78] sm:$0xff]  ;;  %v52_v30 = vld [vmem:[%s3995_s1 + $0x80] sm:$0xff] }
   0xe   :  { %191 = vmatpush.msra.mxu0 %v68_v6  ;;  %2512 = vmatpush.msra.mxu2 %v68_v6  ;;  %v53_v32 = vld [vmem:[%s3995_s1 + $0x88] sm:$0xff]  ;;  %v54_v34 = vld [vmem:[%s3995_s1 + $0x90] sm:$0xff]  ;;  %v55_v36 = vld [vmem:[%s3995_s1 + $0x98] sm:$0xff] }
   0xf   :  { %2345 = vmatmul.msk.f32.vlgmr.msra.gmra.mxu0 %vm75_vm1, %v36_v7  ;;  %2371 = vmatmul.msk.f32.vlgmr.msra.gmra.mxu2 %vm75_vm1, %v62_v17  ;;  %v56_v38 = vld [vmem:[%s3995_s1 + $0xa0] sm:$0xff]  ;;  %v57_v40 = vld [vmem:[%s3995_s1 + $0xa8] sm:$0xff]  ;;  %v58_v42 = vld [vmem:[%s3995_s1 + $0xb0] sm:$0xff] }
  0x10   :  { %v59_v44 = vld [vmem:[%s3995_s1 + $0xb8] sm:$0xff]  ;;  %v60_v46 = vld [vmem:[%s3995_s1 + $0xc0] sm:$0xff]  ;;  %v61_v48 = vld [vmem:[%s3995_s1 + $0xc8] sm:$0xff] }
  0x17   :  { %2346 = vmatmul.msk.f32.gmra.mxu0 %vm75_vm1, %v37_v8  ;;  %2372 = vmatmul.msk.f32.gmra.mxu2 %vm75_vm1, %v63_v19 }
  0x1f   :  { %2347 = vmatmul.msk.f32.gmra.mxu0 %vm75_vm1, %v38_v9  ;;  %2373 = vmatmul.msk.f32.gmra.mxu2 %vm75_vm1, %v64_v21 }
  0x27   :  { %2348 = vmatmul.msk.f32.gmra.mxu0 %vm75_vm1, %v39_v10  ;;  %2374 = vmatmul.msk.f32.gmra.mxu2 %vm75_vm1, %v65_v23  ;;  %v2853_v23 = vld [vmem:[%s3996_s2 + $0xd0] sm:$0xff] }
  0x2f   :  { %2349 = vmatmul.msk.f32.gmra.mxu0 %vm75_vm1, %v40_v11  ;;  %2375 = vmatmul.msk.f32.gmra.mxu2 %vm75_vm1, %v66_v25 }
  0x37   :  { %2350 = vmatmul.msk.f32.gmra.mxu0 %vm75_vm1, %v41_v12  ;;  %2376 = vmatmul.msk.f32.gmra.mxu2 %vm75_vm1, %v67_v27 }
  0x3f   :  { %2351 = vmatmul.msk.f32.gmra.mxu0 %vm75_vm1, %v42_v13 }
  0x47   :  { %2352 = vmatmul.msk.f32.gmra.mxu0 %vm75_vm1, %v43_v14  ;;  %v2837_v14 = vld [vmem:[%s3996_s2 + $0xc8] sm:$0xff] }
  0x4f   :  { %2353 = vmatmul.msk.f32.gmra.mxu0 %vm75_vm1, %v44_v15 }
  0x57   :  { %2354 = vmatmul.msk.f32.gmra.mxu0 %vm75_vm1, %v45_v16 }
  0x5f   :  { %2355 = vmatmul.msk.f32.gmra.mxu0 %vm75_vm1, %v46_v18  ;;  %v4011_v18 = vunpack.c.l.bf16 %v2837_v14 }
  0x67   :  { %2356 = vmatmul.msk.f32.gmra.mxu0 %vm75_vm1, %v47_v20 }
  0x6f   :  { %2357 = vmatmul.msk.f32.gmra.mxu0 %vm75_vm1, %v48_v22 }
  0x77   :  { %2358 = vmatmul.msk.f32.gmra.mxu0 %vm75_vm1, %v49_v24  ;;  %v4010_v24 = vunpack.c.l.bf16 %v2853_v23 }
  0x7f   :  { %2359 = vmatmul.msk.f32.gmra.mxu0 %vm75_vm1, %v50_v26 }
  0x87   :  { %2360 = vmatmul.msk.f32.gmra.mxu0 %vm75_vm1, %v51_v28  ;;  %v2865_v28 = vld [vmem:[%s3996_s2 + $0xd8] sm:$0xff] }
  0x8c   :  { %v2730_v29 = vpop.f32.mrf.mxu0 }
  0x8d   :  { %4136 = vst [vmem:[#allocation5_spill] sm:$0xff] %v2730_v29  ;;  %v289_v17 = vmax.f32 %v2730_v29, 0.0 }
  0x8f   :  { %2361 = vmatmul.msk.f32.gmra.mxu0 %vm75_vm1, %v52_v30  ;;  %v4009_v30 = vunpack.c.l.bf16 %v2865_v28 }
  0x92   :  { %v2796_v52 = vpop.f32.mrf.mxu2 }
  0x93   :  { %4143 = vst [vmem:[#allocation12_spill] sm:$0xff] %v2796_v52  ;;  %v315_v27 = vmax.f32 %v2796_v52, 0.0 }
  0x94   :  { %v2736_v31 = vpop.f32.mrf.mxu0 }
  0x95   :  { %4137 = vst [vmem:[#allocation6_spill] sm:$0xff] %v2736_v31  ;;  %v290_v15 = vmax.f32 %v2736_v31, 0.0 }
  0x97   :  { %2362 = vmatmul.msk.f32.gmra.mxu0 %vm75_vm1, %v53_v32 }
  0x9a   :  { %v2800_v54 = vpop.f32.mrf.mxu2 }
  0x9b   :  { %4144 = vst [vmem:[#allocation13_spill] sm:$0xff] %v2800_v54  ;;  %v316_v26 = vmax.f32 %v2800_v54, 0.0 }
  0x9c   :  { %v2742_v33 = vpop.f32.mrf.mxu0 }
  0x9d   :  { %4138 = vst [vmem:[#allocation7_spill] sm:$0xff] %v2742_v33  ;;  %v291_v12 = vmax.f32 %v2742_v33, 0.0 }
  0x9f   :  { %2363 = vmatmul.msk.f32.gmra.mxu0 %vm75_vm1, %v54_v34  ;;  %v2875_v34 = vld [vmem:[%s3996_s2 + $0xe0] sm:$0xff] }
  0xa2   :  { %v2804_v56 = vpop.f32.mrf.mxu2 }
  0xa3   :  { %4145 = vst [vmem:[#allocation14_spill] sm:$0xff] %v2804_v56  ;;  %v317_v22 = vmax.f32 %v2804_v56, 0.0 }
  0xa4   :  { %v2748_v35 = vpop.f32.mrf.mxu0 }
  0xa5   :  { %4139 = vst [vmem:[#allocation8_spill] sm:$0xff] %v2748_v35  ;;  %v292_v11 = vmax.f32 %v2748_v35, 0.0 }
  0xa7   :  { %2364 = vmatmul.msk.f32.gmra.mxu0 %vm75_vm1, %v55_v36  ;;  %v4008_v36 = vunpack.c.l.bf16 %v2875_v34 }
  0xaa   :  { %v2812_v62 = vpop.f32.mrf.mxu2 }
  0xab   :  { %4146 = vst [vmem:[#allocation15_spill] sm:$0xff] %v2812_v62  ;;  %v318_v21 = vmax.f32 %v2812_v62, 0.0 }
  0xac   :  { %v2754_v37 = vpop.f32.mrf.mxu0 }
  0xad   :  { %4140 = vst [vmem:[#allocation9_spill] sm:$0xff] %v2754_v37  ;;  %v293_v9 = vmax.f32 %v2754_v37, 0.0 }
  0xaf   :  { %2365 = vmatmul.msk.f32.gmra.mxu0 %vm75_vm1, %v56_v38 }
  0xb2   :  { %v2823_v6 = vpop.f32.mrf.mxu2 }
  0xb3   :  { %4149 = vst [vmem:[#allocation18_spill] sm:$0xff] %v2823_v6  ;;  %v319_v20 = vmax.f32 %v2823_v6, 0.0 }
  0xb4   :  { %v2760_v39 = vpop.f32.mrf.mxu0 }
  0xb5   :  { %4141 = vst [vmem:[#allocation10_spill] sm:$0xff] %v2760_v39  ;;  %v294_v8 = vmax.f32 %v2760_v39, 0.0 }
  0xb7   :  { %2366 = vmatmul.msk.f32.gmra.mxu0 %vm75_vm1, %v57_v40  ;;  %v2885_v40 = vld [vmem:[%s3996_s2 + $0xe8] sm:$0xff] }
  0xba   :  { %v2832_v13 = vpop.f32.mrf.mxu2 }
  0xbb   :  { %4151 = vst [vmem:[#allocation20_spill] sm:$0xff] %v2832_v13  ;;  %v320_v16 = vmax.f32 %v2832_v13, 0.0 }
  0xbc   :  { %v2766_v41 = vpop.f32.mrf.mxu0 }
  0xbd   :  { %4142 = vst [vmem:[#allocation11_spill] sm:$0xff] %v2766_v41  ;;  %v295_v7 = vmax.f32 %v2766_v41, 0.0 }
  0xbf   :  { %2367 = vmatmul.msk.f32.gmra.mxu0 %vm75_vm1, %v58_v42  ;;  %v4007_v42 = vunpack.c.l.bf16 %v2885_v40 }
  0xc4   :  { %v2772_v43 = vpop.f32.mrf.mxu0 }
  0xc5   :  { %v296_v5 = vmax.f32 %v2772_v43, 0.0 }
  0xc7   :  { %2368 = vmatmul.msk.f32.gmra.mxu0 %vm75_vm1, %v59_v44 }
  0xcc   :  { %v2778_v45 = vpop.f32.mrf.mxu0 }
  0xcd   :  { %v297_v3 = vmax.f32 %v2778_v45, 0.0 }
  0xcf   :  { %2369 = vmatmul.msk.f32.gmra.mxu0 %vm75_vm1, %v60_v46  ;;  %v2895_v46 = vld [vmem:[%s3996_s2 + $0xf0] sm:$0xff] }
  0xd4   :  { %v2784_v47 = vpop.f32.mrf.mxu0 }
  0xd5   :  { %v298_v2 = vmax.f32 %v2784_v47, 0.0 }
  0xd7   :  { %2370 = vmatmul.msk.f32.gmra.mxu0 %vm75_vm1, %v61_v48  ;;  %v2900_v48 = vld [vmem:[%s3996_s2] sm:$0xff] }
  0xdc   :  { %v2790_v49 = vpop.f32.mrf.mxu0 }
  0xdd   :  { %v299_v1 = vmax.f32 %v2790_v49, 0.0 }
  0xe4   :  { %v2792_v50 = vpop.f32.mrf.mxu0 }
  0xe5   :  { %v300_v0 = vmax.f32 %v2792_v50, 0.0 }
  0xec   :  { %v2794_v51 = vpop.f32.mrf.mxu0 }
  0xed   :  { %v301_v61 = vmax.f32 %v2794_v51, 0.0 }
  0xf4   :  { %v2798_v53 = vpop.f32.mrf.mxu0 }
  0xf5   :  { %v302_v60 = vmax.f32 %v2798_v53, 0.0 }
  0xfc   :  { %v2802_v55 = vpop.f32.mrf.mxu0 }
  0xfd   :  { %v303_v59 = vmax.f32 %v2802_v55, 0.0 }
 0x104   :  { %v2806_v57 = vpop.f32.mrf.mxu0 }
 0x105   :  { %v304_v58 = vmax.f32 %v2806_v57, 0.0 }
 0x107   :  { %421 = vmatpush.msra.mxu1 %v304_v58  ;;  %2513 = vmatpush.msrb.mxu2 %v304_v58  ;;  %v4037_v58 = vunpack.c.l.bf16 %v2900_v48 }
 0x109   :  { %422 = vmatpush.msra.mxu1 %v303_v59  ;;  %2514 = vmatpush.msrb.mxu2 %v303_v59  ;;  %v4006_v59 = vunpack.c.l.bf16 %v2895_v46 }
 0x10b   :  { %423 = vmatpush.msra.mxu1 %v302_v60  ;;  %2515 = vmatpush.msrb.mxu2 %v302_v60 }
 0x10c   :  { %v2814_v63 = vpop.f32.mrf.mxu0 }
 0x10d   :  { %4147 = vst [vmem:[#allocation16_spill] sm:$0xff] %v2814_v63  ;;  %424 = vmatpush.msra.mxu1 %v301_v61  ;;  %2516 = vmatpush.msrb.mxu2 %v301_v61  ;;  %v2913_v61 = vld [vmem:[%s3996_s2 + $0xf8] sm:$0xff] }
 0x10f   :  { %425 = vmatpush.msra.mxu1 %v300_v0  ;;  %2517 = vmatpush.msrb.mxu2 %v300_v0  ;;  %v2918_v0 = vld [vmem:[%s3996_s2 + $0x8] sm:$0xff] }
 0x111   :  { %426 = vmatpush.msra.mxu1 %v299_v1  ;;  %2518 = vmatpush.msrb.mxu2 %v299_v1  ;;  %v4035_v1 = vunpack.c.l.bf16 %v2918_v0 }
 0x113   :  { %427 = vmatpush.msra.mxu1 %v298_v2  ;;  %2519 = vmatpush.msrb.mxu2 %v298_v2 }
 0x114   :  { %v2820_v4 = vpop.f32.mrf.mxu0 }
 0x115   :  { %4148 = vst [vmem:[#allocation17_spill] sm:$0xff] %v2820_v4  ;;  %428 = vmatpush.msra.mxu1 %v297_v3  ;;  %2520 = vmatpush.msrb.mxu2 %v297_v3  ;;  %v4005_v3 = vunpack.c.l.bf16 %v2913_v61 }
 0x117   :  { %429 = vmatpush.msra.mxu1 %v296_v5  ;;  %2521 = vmatpush.msrb.mxu2 %v296_v5 }
 0x119   :  { %430 = vmatpush.msra.mxu1 %v295_v7  ;;  %2522 = vmatpush.msrb.mxu2 %v295_v7 }
 0x11b   :  { %431 = vmatpush.msra.mxu1 %v294_v8  ;;  %2523 = vmatpush.msrb.mxu2 %v294_v8 }
 0x11c   :  { %v2828_v10 = vpop.f32.mrf.mxu0 }
 0x11d   :  { %4150 = vst [vmem:[#allocation19_spill] sm:$0xff] %v2828_v10  ;;  %432 = vmatpush.msra.mxu1 %v293_v9  ;;  %2524 = vmatpush.msrb.mxu2 %v293_v9  ;;  %v2934_v9 = vld [vmem:[%s3996_s2 + $0x10] sm:$0xff] }
 0x11f   :  { %433 = vmatpush.msra.mxu1 %v292_v11  ;;  %2525 = vmatpush.msrb.mxu2 %v292_v11  ;;  %v4033_v11 = vunpack.c.l.bf16 %v2934_v9 }
 0x121   :  { %434 = vmatpush.msra.mxu1 %v291_v12  ;;  %2526 = vmatpush.msrb.mxu2 %v291_v12 }
 0x123   :  { %435 = vmatpush.msra.mxu1 %v290_v15  ;;  %2527 = vmatpush.msrb.mxu2 %v290_v15 }
 0x124   :  { %v2843_v19 = vpop.f32.mrf.mxu0 }
 0x125   :  { %4152 = vst [vmem:[#allocation21_spill] sm:$0xff] %v2843_v19  ;;  %436 = vmatpush.msra.mxu1 %v289_v17  ;;  %2528 = vmatpush.msrb.mxu2 %v289_v17  ;;  %v308_v17 = vmax.f32 %v2843_v19, 0.0 }
 0x126   :  { %512 = vmatmul.f32.vlgmr.msrb.gmra.mxu2 %v4011_v18  ;;  %437 = vmatmul.f32.vlgmr.msra.gmra.mxu1 %v4037_v58  ;;  %v3013_v18 = vld [vmem:[%s3996_s2 + $0x48] sm:$0xff]  ;;  %v3100_v58 = vld [vmem:[%s3996_s2 + $0x80] sm:$0xff] }
 0x127   :  { %534 = vmatpush.msra.mxu2 %v320_v16  ;;  %4161 = vst [vmem:[#allocation30_spill] sm:$0xff] %v3013_v18 }
 0x128   :  { %4168 = vst [vmem:[#allocation37_spill] sm:$0xff] %v3100_v58 }
 0x129   :  { %535 = vmatpush.msra.mxu2 %v319_v20  ;;  %v2946_v20 = vld [vmem:[%s3996_s2 + $0x18] sm:$0xff] }
 0x12b   :  { %536 = vmatpush.msra.mxu2 %v318_v21  ;;  %v4031_v21 = vunpack.c.l.bf16 %v2946_v20 }
 0x12c   :  { %v2856_v25 = vpop.f32.mrf.mxu0 }
 0x12d   :  { %4153 = vst [vmem:[#allocation22_spill] sm:$0xff] %v2856_v25  ;;  %537 = vmatpush.msra.mxu2 %v317_v22  ;;  %v309_v16 = vmax.f32 %v2856_v25, 0.0  ;;  %v307_v22 = vmax.f32 %v2828_v10, 0.0 }
 0x12e   :  { %515 = vmatmul.f32.gmra.mxu2 %v4010_v24  ;;  %440 = vmatmul.f32.gmra.mxu1 %v4035_v1 }
 0x12f   :  { %538 = vmatpush.msra.mxu2 %v316_v26  ;;  %v306_v26 = vmax.f32 %v2820_v4, 0.0 }
 0x131   :  { %539 = vmatpush.msra.mxu2 %v315_v27  ;;  %v4017_v27 = vunpack.c.h.bf16 %v2900_v48 }
 0x134   :  { %v2868_v32 = vpop.f32.mrf.mxu0 }
 0x135   :  { %4154 = vst [vmem:[#allocation23_spill] sm:$0xff] %v2868_v32  ;;  %v310_v15 = vmax.f32 %v2868_v32, 0.0 }
 0x136   :  { %518 = vmatmul.f32.gmra.mxu2 %v4009_v30  ;;  %443 = vmatmul.f32.gmra.mxu1 %v4033_v11 }
 0x13c   :  { %v2878_v38 = vpop.f32.mrf.mxu0 }
 0x13d   :  { %4155 = vst [vmem:[#allocation24_spill] sm:$0xff] %v2878_v38  ;;  %v311_v12 = vmax.f32 %v2878_v38, 0.0  ;;  %v4076_v38 = vunpack.c.h.bf16 %v3100_v58 }
 0x13e   :  { %521 = vmatmul.f32.gmra.mxu2 %v4008_v36  ;;  %446 = vmatmul.f32.gmra.mxu1 %v4031_v21  ;;  %v3002_v36 = vld [vmem:[%s3996_s2 + $0x40] sm:$0xff] }
 0x13f   :  { %4160 = vst [vmem:[#allocation29_spill] sm:$0xff] %v3002_v36  ;;  %v4021_v30 = vunpack.c.l.bf16 %v3002_v36 }
 0x144   :  { %v2888_v44 = vpop.f32.mrf.mxu0 }
 0x145   :  { %4156 = vst [vmem:[#allocation25_spill] sm:$0xff] %v2888_v44  ;;  %v312_v8 = vmax.f32 %v2888_v44, 0.0 }
 0x146   :  { %524 = vmatmul.f32.gmra.mxu2 %v4007_v42 }
 0x14c   :  { %v2904_v60 = vpop.f32.mrf.mxu0 }
 0x14d   :  { %4157 = vst [vmem:[#allocation26_spill] sm:$0xff] %v2904_v60  ;;  %v313_v7 = vmax.f32 %v2904_v60, 0.0 }
 0x14e   :  { %527 = vmatmul.f32.gmra.mxu2 %v4006_v59 }
 0x154   :  { %v2921_v2 = vpop.f32.mrf.mxu0 }
 0x155   :  { %4158 = vst [vmem:[#allocation27_spill] sm:$0xff] %v2921_v2  ;;  %v314_v5 = vmax.f32 %v2921_v2, 0.0 }
 0x156   :  { %530 = vmatmul.f32.gmra.mxu2 %v4005_v3  ;;  %v2991_v3 = vld [vmem:[%s3996_s2 + $0x38] sm:$0xff] }
 0x157   :  { %540 = vmatpush.msra.mxu2 %v314_v5  ;;  %v305_v5 = vmax.f32 %v2814_v63, 0.0  ;;  %4159 = vst [vmem:[#allocation28_spill] sm:$0xff] %v2991_v3  ;;  %v4022_v59 = vunpack.c.l.bf16 %v2991_v3  ;;  %v4052_v63 = vunpack.c.l.bf16 %v3100_v58 }
 0x159   :  { %541 = vmatpush.msra.mxu2 %v313_v7  ;;  %v2958_v7 = vld [vmem:[%s3996_s2 + $0x20] sm:$0xff] }
 0x15a   :  { %v4013_v42 = vunpack.c.h.bf16 %v2958_v7 }
 0x15b   :  { %542 = vmatpush.msra.mxu2 %v312_v8  ;;  %v4029_v8 = vunpack.c.l.bf16 %v2958_v7 }
 0x15d   :  { %543 = vmatpush.msra.mxu2 %v311_v12  ;;  %449 = vmatmul.f32.gmra.mxu1 %v4029_v8  ;;  %v4015_v12 = vunpack.c.h.bf16 %v2918_v0 }
 0x15f   :  { %544 = vmatpush.msra.mxu2 %v310_v15  ;;  %v2969_v15 = vld [vmem:[%s3996_s2 + $0x28] sm:$0xff] }
 0x160   :  { %v4016_v24 = vunpack.c.h.bf16 %v2969_v15 }
 0x161   :  { %545 = vmatpush.msra.mxu2 %v309_v16  ;;  %v4027_v16 = vunpack.c.l.bf16 %v2969_v15 }
 0x163   :  { %546 = vmatpush.msra.mxu2 %v308_v17  ;;  %v4014_v17 = vunpack.c.h.bf16 %v2934_v9 }
 0x165   :  { %547 = vmatpush.msra.mxu2 %v307_v22  ;;  %452 = vmatmul.f32.gmra.mxu1 %v4027_v16  ;;  %v2980_v22 = vld [vmem:[%s3996_s2 + $0x30] sm:$0xff] }
 0x167   :  { %548 = vmatpush.msra.mxu2 %v306_v26  ;;  %v4025_v26 = vunpack.c.l.bf16 %v2980_v22 }
 0x169   :  { %549 = vmatpush.msra.mxu2 %v305_v5  ;;  %v4012_v5 = vunpack.c.h.bf16 %v2946_v20 }
 0x16a   :  { %550 = vmatmul.f32.vlgmr.msra.gmra.mxu2 %v4017_v27  ;;  %v3035_v27 = vld [vmem:[%s3996_s2 + $0x58] sm:$0xff] }
 0x16b   :  { %4163 = vst [vmem:[#allocation32_spill] sm:$0xff] %v3035_v27  ;;  %v4038_v21 = vunpack.c.h.bf16 %v3035_v27 }
 0x16d   :  { %455 = vmatmul.f32.gmra.mxu1 %v4025_v26 }
 0x172   :  { %553 = vmatmul.f32.gmra.mxu2 %v4015_v12 }
 0x175   :  { %458 = vmatmul.f32.gmra.mxu1 %v4022_v59 }
 0x17a   :  { %556 = vmatmul.f32.gmra.mxu2 %v4014_v17  ;;  %v3024_v17 = vld [vmem:[%s3996_s2 + $0x50] sm:$0xff] }
 0x17b   :  { %4162 = vst [vmem:[#allocation31_spill] sm:$0xff] %v3024_v17  ;;  %v4020_v12 = vunpack.c.l.bf16 %v3024_v17  ;;  %v4034_v16 = vunpack.c.h.bf16 %v3024_v17 }
 0x17d   :  { %461 = vmatmul.f32.gmra.mxu1 %v4021_v30 }
 0x182   :  { %559 = vmatmul.f32.gmra.mxu2 %v4012_v5  ;;  %v4018_v5 = vunpack.c.l.bf16 %v3013_v18 }
 0x185   :  { %464 = vmatmul.f32.gmra.mxu1 %v4018_v5  ;;  %v4024_v5 = vunpack.c.l.bf16 %v3035_v27  ;;  %v3198_v27 = vld [vmem:[%s3996_s2 + $0xb0] sm:$0xff] }
 0x186   :  { %v4122_v6 = vunpack.c.h.bf16 %v3198_v27 }
 0x18a   :  { %562 = vmatmul.f32.gmra.mxu2 %v4013_v42  ;;  %v4019_v42 = vunpack.c.h.bf16 %v2980_v22 }
 0x18d   :  { %467 = vmatmul.f32.gmra.mxu1 %v4020_v12  ;;  %v3046_v12 = vld [vmem:[%s3996_s2 + $0x60] sm:$0xff] }
 0x18e   :  { %4164 = vst [vmem:[#allocation33_spill] sm:$0xff] %v3046_v12  ;;  %v4028_v59 = vunpack.c.l.bf16 %v3046_v12  ;;  %v4044_v1 = vunpack.c.h.bf16 %v3046_v12 }
 0x192   :  { %565 = vmatmul.f32.gmra.mxu2 %v4016_v24  ;;  %v4023_v24 = vunpack.c.h.bf16 %v2991_v3 }
 0x195   :  { %470 = vmatmul.f32.gmra.mxu1 %v4024_v5  ;;  %v3059_v5 = vld [vmem:[%s3996_s2 + $0x68] sm:$0xff] }
 0x196   :  { %4165 = vst [vmem:[#allocation34_spill] sm:$0xff] %v3059_v5 }
 0x19a   :  { %568 = vmatmul.f32.gmra.mxu2 %v4019_v42  ;;  %v4026_v42 = vunpack.c.h.bf16 %v3002_v36 }
 0x19d   :  { %473 = vmatmul.f32.gmra.mxu1 %v4028_v59  ;;  %v3072_v59 = vld [vmem:[%s3996_s2 + $0x70] sm:$0xff] }
 0x19e   :  { %4166 = vst [vmem:[#allocation35_spill] sm:$0xff] %v3072_v59  ;;  %v4036_v8 = vunpack.c.l.bf16 %v3072_v59  ;;  %v4058_v10 = vunpack.c.h.bf16 %v3072_v59  ;;  %v3145_v59 = vld [vmem:[%s3996_s2 + $0x98] sm:$0xff] }
 0x19f   :  { %4171 = vst [vmem:[#allocation40_spill] sm:$0xff] %v3145_v59  ;;  %v4075_v12 = vunpack.c.l.bf16 %v3145_v59  ;;  %v4096_v54 = vunpack.c.h.bf16 %v3145_v59  ;;  %v3224_v59 = vld [vmem:[%s3996_s2 + $0xc0] sm:$0xff] }
 0x1a0   :  { %v4118_v13 = vunpack.c.l.bf16 %v3224_v59 }
 0x1a2   :  { %571 = vmatmul.f32.gmra.mxu2 %v4023_v24  ;;  %v4030_v24 = vunpack.c.h.bf16 %v3013_v18 }
 0x1a9   :  { %v3050_v30 = vpop.f32.mrf.mxu2 }
 0x1aa   :  { %574 = vmatmul.f32.gmra.mxu2 %v4026_v42  ;;  %v4032_v42 = vunpack.c.l.bf16 %v3059_v5 }
 0x1ac   :  { %476 = vmatmul.f32.gmra.mxu1 %v4032_v42  ;;  %v3085_v42 = vld [vmem:[%s3996_s2 + $0x78] sm:$0xff] }
 0x1ad   :  { %4167 = vst [vmem:[#allocation36_spill] sm:$0xff] %v3085_v42  ;;  %v4043_v11 = vunpack.c.l.bf16 %v3085_v42 }
 0x1b1   :  { %v3063_v26 = vpop.f32.mrf.mxu2 }
 0x1b2   :  { %577 = vmatmul.f32.gmra.mxu2 %v4030_v24 }
 0x1b4   :  { %479 = vmatmul.f32.gmra.mxu1 %v4036_v8  ;;  %v438_v8 = vpop.f32.mrf.mxu1 }
 0x1b9   :  { %v3077_v24 = vpop.f32.mrf.mxu2 }
 0x1ba   :  { %580 = vmatmul.f32.gmra.mxu2 %v4034_v16 }
 0x1bc   :  { %482 = vmatmul.f32.gmra.mxu1 %v4043_v11  ;;  %v3110_v11 = vpop.f32.mrf.mxu1 }
 0x1c1   :  { %v3092_v16 = vpop.f32.mrf.mxu2 }
 0x1c2   :  { %583 = vmatmul.f32.gmra.mxu2 %v4038_v21  ;;  %v4051_v21 = vunpack.c.h.bf16 %v3059_v5  ;;  %v4065_v5 = vunpack.c.h.bf16 %v3085_v42  ;;  %v3158_v42 = vld [vmem:[%s3996_s2 + $0xa0] sm:$0xff] }
 0x1c3   :  { %4172 = vst [vmem:[#allocation41_spill] sm:$0xff] %v3158_v42  ;;  %v4080_v2 = vunpack.c.l.bf16 %v3158_v42 }
 0x1c4   :  { %485 = vmatmul.f32.gmra.mxu1 %v4052_v63  ;;  %v3130_v63 = vld [vmem:[%s3996_s2 + $0x90] sm:$0xff] }
 0x1c5   :  { %4170 = vst [vmem:[#allocation39_spill] sm:$0xff] %v3130_v63  ;;  %v4066_v32 = vunpack.c.l.bf16 %v3130_v63 }
 0x1c9   :  { %v3104_v4 = vpop.f32.mrf.mxu2 }
 0x1ca   :  { %586 = vmatmul.f32.gmra.mxu2 %v4044_v1  ;;  %v3115_v1 = vld [vmem:[%s3996_s2 + $0x88] sm:$0xff] }
 0x1cb   :  { %4169 = vst [vmem:[#allocation38_spill] sm:$0xff] %v3115_v1  ;;  %v4057_v19 = vunpack.c.l.bf16 %v3115_v1  ;;  %v4079_v60 = vunpack.c.h.bf16 %v3115_v1 }
 0x1cd   :  { %488 = vmatmul.f32.gmra.mxu1 %v4057_v19 }
 0x1d1   :  { %v3121_v25 = vpop.f32.mrf.mxu2 }
 0x1d2   :  { %589 = vmatmul.f32.gmra.mxu2 %v4051_v21  ;;  %v3125_v21 = vpop.f32.mrf.mxu1 }
 0x1d5   :  { %491 = vmatmul.f32.gmra.mxu1 %v4066_v32 }
 0x1da   :  { %592 = vmatmul.f32.gmra.mxu2 %v4058_v10  ;;  %v3138_v19 = vpop.f32.mrf.mxu1  ;;  %v3140_v10 = vpop.f32.mrf.mxu2 }
 0x1dd   :  { %494 = vmatmul.f32.gmra.mxu1 %v4075_v12  ;;  %v420_v12 = vld [vmem:[%s4000_s6 + $0x18] sm:$0xff] }
 0x1de   :  { %2529 = vmatpush.msra.mxu3 %v420_v12  ;;  %756 = vmatpush.msrb.mxu2 %v420_v12 }
 0x1df   :  { %1255 = vmatpush.msrb.mxu1 %v420_v12  ;;  %v3182_v12 = vld [vmem:[%s3996_s2 + $0xa8] sm:$0xff] }
 0x1e0   :  { %v4090_v1 = vunpack.c.l.bf16 %v3182_v12  ;;  %v4117_v62 = vunpack.c.h.bf16 %v3182_v12 }
 0x1e2   :  { %595 = vmatmul.f32.gmra.mxu2 %v4065_v5  ;;  %v3153_v5 = vpop.f32.mrf.mxu1 }
 0x1e5   :  { %497 = vmatmul.f32.gmra.mxu1 %v4080_v2  ;;  %v417_v2 = vld [vmem:[%s4000_s6] sm:$0xff] }
 0x1ea   :  { %598 = vmatmul.f32.gmra.mxu2 %v4076_v38  ;;  %v418_v38 = vld [vmem:[%s4000_s6 + $0x8] sm:$0xff] }
 0x1ed   :  { %v551_v32 = vpop.f32.mrf.mxu2  ;;  %500 = vmatmul.f32.gmra.mxu1 %v4090_v1  ;;  %v3211_v1 = vld [vmem:[%s3996_s2 + $0xb8] sm:$0xff]  ;;  %s2563_s2 = smov [#allocation2]  }
 0x1ee   :  { %v3160_v44 = vadd.f32 %v551_v32, %v438_v8  ;;  %v419_v32 = vld [vmem:[%s4000_s6 + $0x10] sm:$0xff]  ;;  %v453_v8 = vpop.f32.mrf.mxu1  ;;  %v4103_v56 = vunpack.c.l.bf16 %v3211_v1  ;;  %v4119_v36 = vunpack.c.h.bf16 %v3211_v1  ;;  %s2330_s12 = sshll.u32 %s2563_s2, 4  ;;  %s2331_s12 = int_to_ptr.vmem [resolvable:$true] %s2330_s12 }
 0x1ef   :  { %2530 = vmatpush.msra.mxu3 %v419_v32  ;;  %757 = vmatpush.msrb.mxu2 %v419_v32 }
 0x1f0   :  { %1256 = vmatpush.msrb.mxu1 %v419_v32 }
 0x1f1   :  { %2531 = vmatpush.msra.mxu3 %v418_v38  ;;  %758 = vmatpush.msrb.mxu2 %v418_v38 }
 0x1f2   :  { %601 = vmatmul.f32.gmra.mxu2 %v4079_v60  ;;  %v4089_v60 = vunpack.c.h.bf16 %v3130_v63  ;;  %1257 = vmatpush.msrb.mxu1 %v418_v38  ;;  %v4095_v38 = vunpack.c.l.bf16 %v3198_v27  ;;  %v4104_v63 = vunpack.c.h.bf16 %v3158_v42 }
 0x1f3   :  { %2532 = vmatpush.msra.mxu3 %v417_v2  ;;  %759 = vmatpush.msrb.mxu2 %v417_v2 }
 0x1f4   :  { %1258 = vmatpush.msrb.mxu1 %v417_v2 }
 0x1f5   :  { %v3177_v58 = vpop.f32.mrf.mxu2  ;;  %503 = vmatmul.f32.gmra.mxu1 %v4095_v38 }
 0x1f6   :  { %v456_v32 = vpop.f32.mrf.mxu1 }
 0x1fa   :  { %604 = vmatmul.f32.gmra.mxu2 %v4089_v60 }
 0x1fd   :  { %v3193_v52 = vpop.f32.mrf.mxu2  ;;  %506 = vmatmul.f32.gmra.mxu1 %v4103_v56 }
 0x1fe   :  { %v459_v2 = vpop.f32.mrf.mxu1 }
 0x202   :  { %607 = vmatmul.f32.gmra.mxu2 %v4096_v54 }
 0x205   :  { %v3206_v60 = vpop.f32.mrf.mxu2  ;;  %509 = vmatmul.f32.gmra.mxu1 %v4118_v13 }
 0x206   :  { %v462_v38 = vpop.f32.mrf.mxu1 }
 0x20a   :  { %610 = vmatmul.f32.gmra.mxu2 %v4104_v63 }
 0x20d   :  { %v3219_v54 = vpop.f32.mrf.mxu2 }
 0x20e   :  { %v465_v63 = vpop.f32.mrf.mxu1 }
 0x212   :  { %613 = vmatmul.f32.gmra.mxu2 %v4117_v62 }
 0x215   :  { %v566_v56 = vpop.f32.mrf.mxu2 }
 0x216   :  { %v567_v42 = vadd.f32 %v566_v56, %v453_v8  ;;  %v468_v3 = vpop.f32.mrf.mxu1  ;;  %v4120_v56 = vunpack.c.h.bf16 %v3224_v59 }
 0x218   :  { %2382 = vmatmul.msk.f32.vlgmr.msra.gmra.mxu3 %vm647_vm2, %v567_v42 }
 0x21a   :  { %616 = vmatmul.f32.gmra.mxu2 %v4122_v6 }
 0x21d   :  { %v569_v17 = vpop.f32.mrf.mxu2 }
 0x21e   :  { %v570_v18 = vadd.f32 %v569_v17, %v456_v32  ;;  %v471_v42 = vpop.f32.mrf.mxu1  ;;  %v4121_v32 = vunpack.c.h.bf16 %v2837_v14 }
 0x220   :  { %2383 = vmatmul.msk.f32.gmra.mxu3 %vm647_vm2, %v570_v18 }
 0x222   :  { %619 = vmatmul.f32.gmra.mxu2 %v4119_v36 }
 0x225   :  { %v572_v62 = vpop.f32.mrf.mxu2 }
 0x226   :  { %v573_v13 = vadd.f32 %v572_v62, %v459_v2  ;;  %v474_v18 = vpop.f32.mrf.mxu1  ;;  %v4123_v62 = vunpack.c.h.bf16 %v2853_v23 }
 0x228   :  { %2384 = vmatmul.msk.f32.gmra.mxu3 %vm647_vm2, %v573_v13 }
 0x22a   :  { %622 = vmatmul.f32.gmra.mxu2 %v4120_v56 }
 0x22d   :  { %v575_v8 = vpop.f32.mrf.mxu2 }
 0x22e   :  { %v576_v17 = vadd.f32 %v575_v8, %v462_v38  ;;  %v477_v56 = vpop.f32.mrf.mxu1  ;;  %v4128_v38 = vunpack.c.h.bf16 %v2865_v28 }
 0x230   :  { %2385 = vmatmul.msk.f32.gmra.mxu3 %vm647_vm2, %v576_v17 }
 0x232   :  { %625 = vmatmul.f32.gmra.mxu2 %v4121_v32  ;;  %v4124_v32 = vunpack.c.h.bf16 %v2875_v34 }
 0x235   :  { %v578_v36 = vpop.f32.mrf.mxu2 }
 0x236   :  { %v579_v2 = vadd.f32 %v578_v36, %v465_v63  ;;  %v480_v63 = vpop.f32.mrf.mxu1 }
 0x238   :  { %2386 = vmatmul.msk.f32.gmra.mxu3 %vm647_vm2, %v579_v2  ;;  %v4125_v2 = vunpack.c.h.bf16 %v2885_v40 }
 0x23a   :  { %628 = vmatmul.f32.gmra.mxu2 %v4123_v62 }
 0x23d   :  { %v581_v13 = vpop.f32.mrf.mxu2 }
 0x23e   :  { %v582_v8 = vadd.f32 %v581_v13, %v468_v3  ;;  %v483_v3 = vpop.f32.mrf.mxu1 }
 0x240   :  { %2387 = vmatmul.msk.f32.gmra.mxu3 %vm647_vm2, %v582_v8  ;;  %v4126_v8 = vunpack.c.h.bf16 %v2895_v46 }
 0x242   :  { %631 = vmatmul.f32.gmra.mxu2 %v4128_v38 }
 0x245   :  { %v584_v17 = vpop.f32.mrf.mxu2 }
 0x246   :  { %v585_v6 = vadd.f32 %v584_v17, %v471_v42 }
 0x248   :  { %2388 = vmatmul.msk.f32.gmra.mxu3 %vm647_vm2, %v585_v6  ;;  %v486_v6 = vpop.f32.mrf.mxu1 }
 0x24a   :  { %634 = vmatmul.f32.gmra.mxu2 %v4124_v32  ;;  %v4127_v32 = vunpack.c.h.bf16 %v2913_v61 }
 0x24d   :  { %v587_v36 = vpop.f32.mrf.mxu2 }
 0x24e   :  { %v588_v62 = vadd.f32 %v587_v36, %v474_v18 }
 0x250   :  { %2389 = vmatmul.msk.f32.gmra.mxu3 %vm647_vm2, %v588_v62  ;;  %v489_v36 = vpop.f32.mrf.mxu1 }
 0x252   :  { %637 = vmatmul.f32.gmra.mxu2 %v4125_v2 }
 0x255   :  { %v590_v13 = vpop.f32.mrf.mxu2 }
 0x256   :  { %v591_v42 = vadd.f32 %v590_v13, %v477_v56 }
 0x258   :  { %2390 = vmatmul.msk.f32.gmra.mxu3 %vm647_vm2, %v591_v42  ;;  %v492_v42 = vpop.f32.mrf.mxu1 }
 0x25a   :  { %640 = vmatmul.f32.gmra.mxu2 %v4126_v8  ;;  %v555_v8 = vadd.f32 %v3177_v58, %v3110_v11 }
 0x25d   :  { %v593_v17 = vpop.f32.mrf.mxu2 }
 0x25e   :  { %v594_v18 = vadd.f32 %v593_v17, %v480_v63 }
 0x260   :  { %2391 = vmatmul.msk.f32.gmra.mxu3 %vm647_vm2, %v594_v18  ;;  %v561_v18 = vadd.f32 %v3206_v60, %v3138_v19 }
 0x262   :  { %643 = vmatmul.f32.gmra.mxu2 %v4127_v32  ;;  %v4190_v32 = vld [vmem:[#allocation15_spill] sm:$0xff] }
 0x265   :  { %v596_v62 = vpop.f32.mrf.mxu2 }
 0x266   :  { %v597_v2 = vadd.f32 %v596_v62, %v483_v3  ;;  %v558_v3 = vadd.f32 %v3193_v52, %v3125_v21  ;;  %v564_v52 = vadd.f32 %v3219_v54, %v3153_v5 }
 0x268   :  { %2392 = vmatmul.msk.f32.gmra.mxu3 %vm647_vm2, %v597_v2  ;;  %v495_v2 = vpop.f32.mrf.mxu1 }
 0x26a   :  { %2377 = vmatmul.msk.f32.vlgmr.msrb.gmra.mxu2 %vm647_vm2, %v3160_v44 }
 0x26d   :  { %v599_v56 = vpop.f32.mrf.mxu2 }
 0x26e   :  { %v600_v13 = vadd.f32 %v599_v56, %v486_v6 }
 0x270   :  { %2393 = vmatmul.msk.f32.gmra.mxu3 %vm647_vm2, %v600_v13  ;;  %v498_v58 = vpop.f32.mrf.mxu1 }
 0x272   :  { %2378 = vmatmul.msk.f32.gmra.mxu2 %vm647_vm2, %v555_v8 }
 0x275   :  { %v602_v63 = vpop.f32.mrf.mxu2 }
 0x276   :  { %v603_v17 = vadd.f32 %v602_v63, %v489_v36 }
 0x278   :  { %2394 = vmatmul.msk.f32.gmra.mxu3 %vm647_vm2, %v603_v17  ;;  %v501_v62 = vpop.f32.mrf.mxu1 }
 0x27a   :  { %2379 = vmatmul.msk.f32.gmra.mxu2 %vm647_vm2, %v558_v3 }
 0x27d   :  { %v605_v44 = vpop.f32.mrf.mxu2 }
 0x27e   :  { %v606_v6 = vadd.f32 %v605_v44, %v492_v42 }
 0x280   :  { %2395 = vmatmul.msk.f32.gmra.mxu3 %vm647_vm2, %v606_v6  ;;  %v504_v56 = vpop.f32.mrf.mxu1 }
 0x282   :  { %2380 = vmatmul.msk.f32.gmra.mxu2 %vm647_vm2, %v561_v18 }
 0x285   :  { %v608_v11 = vpop.f32.mrf.mxu2 }
 0x286   :  { %v609_v8 = vadd.f32 %v608_v11, %v495_v2 }
 0x288   :  { %2396 = vmatmul.msk.f32.gmra.mxu3 %vm647_vm2, %v609_v8  ;;  %v507_v54 = vpop.f32.mrf.mxu1 }
 0x28a   :  { %2381 = vmatmul.msk.f32.gmra.mxu2 %vm647_vm2, %v564_v52 }
 0x28d   :  { %v611_v21 = vpop.f32.mrf.mxu2 }
 0x28e   :  { %v612_v36 = vadd.f32 %v611_v21, %v498_v58 }
 0x290   :  { %2397 = vmatmul.msk.f32.gmra.mxu3 %vm647_vm2, %v612_v36  ;;  %v510_v44 = vpop.f32.mrf.mxu1 }
 0x295   :  { %v614_v19 = vpop.f32.mrf.mxu2 }
 0x296   :  { %v615_v60 = vadd.f32 %v614_v19, %v501_v62 }
 0x298   :  { %2398 = vmatmul.msk.f32.gmra.mxu3 %vm647_vm2, %v615_v60 }
 0x29b   :  { %v3293_v13 = vpop.f32.mrf.mxu3 }
 0x29d   :  { %v617_v42 = vpop.f32.mrf.mxu2 }
 0x29e   :  { %v618_v63 = vadd.f32 %v617_v42, %v504_v56 }
 0x2a0   :  { %2399 = vmatmul.msk.f32.gmra.mxu3 %vm647_vm2, %v618_v63 }
 0x2a3   :  { %v3296_v5 = vpop.f32.mrf.mxu3 }
 0x2a5   :  { %v620_v17 = vpop.f32.mrf.mxu2 }
 0x2a6   :  { %v621_v3 = vadd.f32 %v620_v17, %v507_v54 }
 0x2a8   :  { %2400 = vmatmul.msk.f32.gmra.mxu3 %vm647_vm2, %v621_v3 }
 0x2ab   :  { %v782_v2 = vpop.f32.mrf.mxu3 }
 0x2ad   :  { %v623_v6 = vpop.f32.mrf.mxu2 }
 0x2ae   :  { %v624_v18 = vadd.f32 %v623_v6, %v510_v44 }
 0x2b0   :  { %2401 = vmatmul.msk.f32.gmra.mxu3 %vm647_vm2, %v624_v18 }
 0x2b3   :  { %v785_v58 = vpop.f32.mrf.mxu3 }
 0x2b5   :  { %v626_v11 = vpop.f32.mrf.mxu2 }
 0x2b6   :  { %v627_v8 = vadd.f32 %v626_v11, %v3050_v30 }
 0x2b8   :  { %2402 = vmatmul.msk.f32.gmra.mxu3 %vm647_vm2, %v627_v8 }
 0x2bb   :  { %v788_v52 = vpop.f32.mrf.mxu3 }
 0x2bd   :  { %v629_v21 = vpop.f32.mrf.mxu2 }
 0x2be   :  { %v630_v62 = vadd.f32 %v629_v21, %v3063_v26 }
 0x2c0   :  { %2403 = vmatmul.msk.f32.gmra.mxu3 %vm647_vm2, %v630_v62 }
 0x2c3   :  { %v791_v36 = vpop.f32.mrf.mxu3 }
 0x2c5   :  { %v632_v19 = vpop.f32.mrf.mxu2 }
 0x2c6   :  { %v633_v60 = vadd.f32 %v632_v19, %v3077_v24 }
 0x2c8   :  { %2404 = vmatmul.msk.f32.gmra.mxu3 %vm647_vm2, %v633_v60 }
 0x2cb   :  { %v794_v56 = vpop.f32.mrf.mxu3 }
 0x2cc   :  { %v868_v60 = vadd.f32 %v794_v56, %v2792_v50 }
 0x2cd   :  { %v635_v42 = vpop.f32.mrf.mxu2 }
 0x2ce   :  { %v636_v63 = vadd.f32 %v635_v42, %v3092_v16 }
 0x2d0   :  { %2405 = vmatmul.msk.f32.gmra.mxu3 %vm647_vm2, %v636_v63  ;;  %v867_v63 = vadd.f32 %v791_v36, %v2790_v49  ;;  %v863_v36 = vadd.f32 %v3296_v5, %v2766_v41  ;;  %v4195_v41 = vld [vmem:[#allocation12_spill] sm:$0xff] }
 0x2d3   :  { %v797_v30 = vpop.f32.mrf.mxu3 }
 0x2d4   :  { %v869_v19 = vadd.f32 %v797_v30, %v2794_v51  ;;  %v899_v30 = vmax.f32 %v867_v63, 0.0 }
 0x2d5   :  { %v638_v54 = vpop.f32.mrf.mxu2 }
 0x2d6   :  { %v639_v17 = vadd.f32 %v638_v54, %v3104_v4  ;;  %v901_v54 = vmax.f32 %v869_v19, 0.0 }
 0x2d8   :  { %2406 = vmatmul.msk.f32.gmra.mxu3 %vm647_vm2, %v639_v17 }
 0x2db   :  { %v800_v26 = vpop.f32.mrf.mxu3 }
 0x2dc   :  { %v870_v21 = vadd.f32 %v800_v26, %v2798_v53  ;;  %v900_v26 = vmax.f32 %v868_v60, 0.0 }
 0x2dd   :  { %v641_v3 = vpop.f32.mrf.mxu2 }
 0x2de   :  { %v642_v44 = vadd.f32 %v641_v3, %v3121_v25  ;;  %v902_v42 = vmax.f32 %v870_v21, 0.0  ;;  %v866_v3 = vadd.f32 %v788_v52, %v2784_v47  ;;  %v862_v52 = vadd.f32 %v3293_v13, %v2760_v39 }
 0x2e0   :  { %2407 = vmatmul.msk.f32.gmra.mxu3 %vm647_vm2, %v642_v44  ;;  %v865_v44 = vadd.f32 %v785_v58, %v2778_v45  ;;  %v898_v56 = vmax.f32 %v866_v3, 0.0  ;;  %v895_v58 = vmax.f32 %v863_v36, 0.0 }
 0x2e3   :  { %v803_v24 = vpop.f32.mrf.mxu3 }
 0x2e4   :  { %v871_v11 = vadd.f32 %v803_v24, %v2802_v55  ;;  %v864_v24 = vadd.f32 %v782_v2, %v2772_v43 }
 0x2e5   :  { %v644_v6 = vpop.f32.mrf.mxu2 }
 0x2e6   :  { %v645_v18 = vadd.f32 %v644_v6, %v3140_v10  ;;  %v903_v25 = vmax.f32 %v871_v11, 0.0  ;;  %v896_v11 = vmax.f32 %v864_v24, 0.0 }
 0x2e8   :  { %2408 = vmatmul.msk.f32.gmra.mxu3 %vm647_vm2, %v645_v18  ;;  %v897_v18 = vmax.f32 %v865_v44, 0.0 }
 0x2eb   :  { %v806_v16 = vpop.f32.mrf.mxu3 }
 0x2ec   :  { %v872_v8 = vadd.f32 %v806_v16, %v2806_v57 }
 0x2ed   :  { %v761_v4 = vpop.f32.mrf.mxu2 }
 0x2ee   :  { %v904_v62 = vmax.f32 %v872_v8, 0.0  ;;  %v894_v8 = vmax.f32 %v862_v52, 0.0  ;;  %v857_v3 = vadd.f32 %v761_v4, %v2730_v29  ;;  %v4176_v52 = vunpack.c.l.bf16 %v2946_v20 }
 0x2f0   :  { %921 = vmatpush.msrb.mxu3 %v904_v62 }
 0x2f2   :  { %922 = vmatpush.msrb.mxu3 %v903_v25 }
 0x2f3   :  { %v3319_v10 = vpop.f32.mrf.mxu3 }
 0x2f4   :  { %923 = vmatpush.msrb.mxu3 %v902_v42 }
 0x2f5   :  { %v764_v17 = vpop.f32.mrf.mxu2 }
 0x2f6   :  { %924 = vmatpush.msrb.mxu3 %v901_v54  ;;  %v858_v42 = vadd.f32 %v764_v17, %v2736_v31 }
 0x2f8   :  { %925 = vmatpush.msrb.mxu3 %v900_v26  ;;  %v890_v44 = vmax.f32 %v858_v42, 0.0 }
 0x2fa   :  { %926 = vmatpush.msrb.mxu3 %v899_v30  ;;  %v889_v30 = vmax.f32 %v857_v3, 0.0 }
 0x2fb   :  { %v3325_v6 = vpop.f32.mrf.mxu3 }
 0x2fc   :  { %927 = vmatpush.msrb.mxu3 %v898_v56  ;;  %v4173_v56 = vunpack.c.l.bf16 %v2900_v48 }
 0x2fd   :  { %v767_v16 = vpop.f32.mrf.mxu2 }
 0x2fe   :  { %928 = vmatpush.msrb.mxu3 %v897_v18  ;;  %v859_v60 = vadd.f32 %v767_v16, %v2742_v33  ;;  %v4174_v18 = vunpack.c.l.bf16 %v2918_v0  ;;  %v4175_v16 = vunpack.c.l.bf16 %v2934_v9 }
 0x300   :  { %929 = vmatpush.msrb.mxu3 %v896_v11  ;;  %v891_v26 = vmax.f32 %v859_v60, 0.0  ;;  %v4180_v60 = vld [vmem:[#allocation28_spill] sm:$0xff] }
 0x302   :  { %930 = vmatpush.msrb.mxu3 %v895_v58  ;;  %v4177_v58 = vunpack.c.l.bf16 %v2958_v7 }
 0x303   :  { %v3331_v2 = vpop.f32.mrf.mxu3 }
 0x304   :  { %931 = vmatpush.msrb.mxu3 %v894_v8 }
 0x305   :  { %v770_v21 = vpop.f32.mrf.mxu2 }
 0x306   :  { %v860_v5 = vadd.f32 %v770_v21, %v2748_v35  ;;  %v4178_v21 = vunpack.c.l.bf16 %v2969_v15 }
 0x308   :  { %v892_v63 = vmax.f32 %v860_v5, 0.0  ;;  %v4179_v5 = vunpack.c.l.bf16 %v2980_v22 }
 0x30b   :  { %v3333_v62 = vpop.f32.mrf.mxu3 }
 0x30d   :  { %v773_v19 = vpop.f32.mrf.mxu2 }
 0x30e   :  { %v861_v25 = vadd.f32 %v773_v19, %v2754_v37 }
 0x310   :  { %v893_v13 = vmax.f32 %v861_v25, 0.0 }
 0x312   :  { %932 = vmatpush.msrb.mxu3 %v893_v13  ;;  %v4181_v13 = vunpack.c.l.bf16 %v4180_v60 }
 0x313   :  { %v821_v54 = vpop.f32.mrf.mxu3 }
 0x314   :  { %933 = vmatpush.msrb.mxu3 %v892_v63  ;;  %v4182_v63 = vld [vmem:[#allocation29_spill] sm:$0xff] }
 0x315   :  { %v4183_v3 = vunpack.c.l.bf16 %v4182_v63 }
 0x316   :  { %934 = vmatpush.msrb.mxu3 %v891_v26 }
 0x318   :  { %935 = vmatpush.msrb.mxu3 %v890_v44  ;;  %v4184_v44 = vld [vmem:[#allocation30_spill] sm:$0xff] }
 0x31a   :  { %936 = vmatpush.msrb.mxu3 %v889_v30  ;;  %v4185_v30 = vunpack.c.l.bf16 %v4184_v44 }
 0x31b   :  { %v824_v24 = vpop.f32.mrf.mxu3  ;;  %937 = vmatmul.f32.vlgmr.msrb.gmra.mxu3 %v4173_v56 }
 0x323   :  { %v827_v36 = vpop.f32.mrf.mxu3  ;;  %940 = vmatmul.f32.gmra.mxu3 %v4174_v18  ;;  %v4186_v18 = vld [vmem:[#allocation31_spill] sm:$0xff] }
 0x32b   :  { %v830_v17 = vpop.f32.mrf.mxu3  ;;  %943 = vmatmul.f32.gmra.mxu3 %v4175_v16  ;;  %v4187_v16 = vunpack.c.l.bf16 %v4186_v18 }
 0x333   :  { %v833_v4 = vpop.f32.mrf.mxu3  ;;  %946 = vmatmul.f32.gmra.mxu3 %v4176_v52  ;;  %v4188_v52 = vld [vmem:[#allocation18_spill] sm:$0xff] }
 0x33b   :  { %v836_v11 = vpop.f32.mrf.mxu3  ;;  %949 = vmatmul.f32.gmra.mxu3 %v4177_v58 }
 0x343   :  { %v839_v8 = vpop.f32.mrf.mxu3  ;;  %952 = vmatmul.f32.gmra.mxu3 %v4178_v21  ;;  %v4189_v21 = vld [vmem:[#allocation20_spill] sm:$0xff] }
 0x34b   :  { %v842_v19 = vpop.f32.mrf.mxu3  ;;  %955 = vmatmul.f32.gmra.mxu3 %v4179_v5 }
 0x353   :  { %v845_v25 = vpop.f32.mrf.mxu3  ;;  %958 = vmatmul.f32.gmra.mxu3 %v4181_v13  ;;  %v4191_v13 = vld [vmem:[#allocation14_spill] sm:$0xff] }
 0x354   :  { %v885_v31 = vadd.f32 %v845_v25, %v4191_v13  ;;  %v4198_v25 = vld [vmem:[#allocation25_spill] sm:$0xff] }
 0x35b   :  { %v848_v42 = vpop.f32.mrf.mxu3  ;;  %961 = vmatmul.f32.gmra.mxu3 %v4183_v3  ;;  %v4192_v3 = vld [vmem:[#allocation13_spill] sm:$0xff] }
 0x35c   :  { %v886_v38 = vadd.f32 %v848_v42, %v4190_v32  ;;  %v884_v35 = vadd.f32 %v842_v19, %v4192_v3 }
 0x35e   :  { %v918_v37 = vmax.f32 %v886_v38, 0.0  ;;  %v916_v42 = vmax.f32 %v884_v35, 0.0  ;;  %v4199_v38 = vld [vmem:[#allocation33_spill] sm:$0xff]  ;;  %v4203_v35 = vld [vmem:[#allocation22_spill] sm:$0xff] }
 0x35f   :  { %v4200_v19 = vunpack.c.l.bf16 %v4199_v38 }
 0x363   :  { %v851_v26 = vpop.f32.mrf.mxu3  ;;  %964 = vmatmul.f32.gmra.mxu3 %v4185_v30  ;;  %v4193_v30 = vld [vmem:[#allocation32_spill] sm:$0xff] }
 0x364   :  { %v887_v58 = vadd.f32 %v851_v26, %v4188_v52  ;;  %v4194_v39 = vunpack.c.l.bf16 %v4193_v30  ;;  %v917_v26 = vmax.f32 %v885_v31, 0.0  ;;  %v4196_v52 = vld [vmem:[#allocation27_spill] sm:$0xff] }
 0x365   :  { %v4202_v31 = vld [vmem:[#allocation23_spill] sm:$0xff] }
 0x366   :  { %v919_v33 = vmax.f32 %v887_v58, 0.0  ;;  %v880_v58 = vadd.f32 %v830_v17, %v4198_v25 }
 0x36b   :  { %v854_v56 = vpop.f32.mrf.mxu3  ;;  %967 = vmatmul.f32.gmra.mxu3 %v4187_v16  ;;  %v883_v16 = vadd.f32 %v839_v8, %v4195_v41  ;;  %v878_v8 = vadd.f32 %v824_v24, %v4202_v31  ;;  %v4208_v24 = vld [vmem:[#allocation17_spill] sm:$0xff] }
 0x36c   :  { %v888_v5 = vadd.f32 %v854_v56, %v4189_v21  ;;  %v882_v56 = vadd.f32 %v836_v11, %v4196_v52  ;;  %v912_v11 = vmax.f32 %v880_v58, 0.0  ;;  %v874_v58 = vadd.f32 %v3325_v6, %v4208_v24 }
 0x36e   :  { %v920_v29 = vmax.f32 %v888_v5, 0.0  ;;  %v4197_v5 = vld [vmem:[#allocation26_spill] sm:$0xff] }
 0x36f   :  { %v881_v32 = vadd.f32 %v833_v4, %v4197_v5 }
 0x370   :  { %1034 = vmatpush.msrb.mxu0 %v920_v29  ;;  %v915_v29 = vmax.f32 %v883_v16, 0.0  ;;  %v4204_v16 = vld [vmem:[#allocation21_spill] sm:$0xff] }
 0x371   :  { %v876_v17 = vadd.f32 %v3333_v62, %v4204_v16 }
 0x372   :  { %1035 = vmatpush.msrb.mxu0 %v919_v33  ;;  %v914_v33 = vmax.f32 %v882_v56, 0.0  ;;  %v910_v56 = vmax.f32 %v878_v8, 0.0  ;;  %v4210_v8 = vld [vmem:[#allocation35_spill] sm:$0xff] }
 0x373   :  { %970 = vmatmul.f32.gmra.mxu3 %v4194_v39  ;;  %v4201_v39 = vld [vmem:[#allocation24_spill] sm:$0xff] }
 0x374   :  { %1036 = vmatpush.msrb.mxu0 %v918_v37  ;;  %v879_v3 = vadd.f32 %v827_v36, %v4201_v39  ;;  %v913_v37 = vmax.f32 %v881_v32, 0.0 }
 0x376   :  { %1037 = vmatpush.msrb.mxu0 %v917_v26  ;;  %v877_v26 = vadd.f32 %v821_v54, %v4203_v35  ;;  %v911_v4 = vmax.f32 %v879_v3, 0.0  ;;  %v908_v54 = vmax.f32 %v876_v17, 0.0  ;;  %v4215_v17 = vunpack.c.h.bf16 %v2918_v0  ;;  %v4225_v0 = vld [vmem:[#allocation40_spill] sm:$0xff] }
 0x378   :  { %1038 = vmatpush.msrb.mxu0 %v916_v42  ;;  %v4205_v42 = vld [vmem:[#allocation34_spill] sm:$0xff]  ;;  %v909_v32 = vmax.f32 %v877_v26, 0.0  ;;  %v4213_v26 = vld [vmem:[#allocation36_spill] sm:$0xff] }
 0x379   :  { %v4214_v6 = vunpack.c.l.bf16 %v4213_v26 }
 0x37a   :  { %1039 = vmatpush.msrb.mxu0 %v915_v29  ;;  %v4206_v29 = vunpack.c.l.bf16 %v4205_v42 }
 0x37b   :  { %973 = vmatmul.f32.gmra.mxu3 %v4200_v19  ;;  %v4207_v19 = vld [vmem:[#allocation19_spill] sm:$0xff] }
 0x37c   :  { %1040 = vmatpush.msrb.mxu0 %v914_v33  ;;  %v875_v36 = vadd.f32 %v3331_v2, %v4207_v19  ;;  %v4209_v33 = vld [vmem:[#allocation16_spill] sm:$0xff]  ;;  %v4212_v2 = vunpack.c.h.bf16 %v2900_v48  ;;  %v4222_v48 = vld [vmem:[#allocation39_spill] sm:$0xff] }
 0x37d   :  { %v873_v3 = vadd.f32 %v3319_v10, %v4209_v33  ;;  %v4216_v10 = vld [vmem:[#allocation37_spill] sm:$0xff] }
 0x37e   :  { %1041 = vmatpush.msrb.mxu0 %v913_v37  ;;  %v907_v62 = vmax.f32 %v875_v36, 0.0  ;;  %v906_v37 = vmax.f32 %v874_v58, 0.0  ;;  %v4219_v36 = vld [vmem:[#allocation38_spill] sm:$0xff]  ;;  %v4221_v58 = vunpack.c.h.bf16 %v2946_v20  ;;  %v4231_v20 = vunpack.c.l.bf16 %v3182_v12 }
 0x380   :  { %1042 = vmatpush.msrb.mxu0 %v912_v11  ;;  %v4211_v11 = vunpack.c.l.bf16 %v4210_v8 }
 0x382   :  { %1043 = vmatpush.msrb.mxu0 %v911_v4  ;;  %v905_v4 = vmax.f32 %v873_v3, 0.0  ;;  %v4224_v3 = vunpack.c.h.bf16 %v2958_v7  ;;  %v4233_v7 = vunpack.c.l.bf16 %v3198_v27 }
 0x383   :  { %976 = vmatmul.f32.gmra.mxu3 %v4206_v29  ;;  %v4218_v29 = vunpack.c.h.bf16 %v2934_v9  ;;  %v4228_v9 = vld [vmem:[#allocation41_spill] sm:$0xff] }
 0x384   :  { %1044 = vmatpush.msrb.mxu0 %v910_v56  ;;  %v4217_v56 = vunpack.c.l.bf16 %v4216_v10 }
 0x386   :  { %1045 = vmatpush.msrb.mxu0 %v909_v32  ;;  %v4220_v32 = vunpack.c.l.bf16 %v4219_v36 }
 0x388   :  { %1046 = vmatpush.msrb.mxu0 %v908_v54  ;;  %v4223_v54 = vunpack.c.l.bf16 %v4222_v48 }
 0x38a   :  { %1047 = vmatpush.msrb.mxu0 %v907_v62  ;;  %v4226_v62 = vunpack.c.l.bf16 %v4225_v0 }
 0x38b   :  { %979 = vmatmul.f32.gmra.mxu3 %v4211_v11  ;;  %v4229_v11 = vunpack.c.l.bf16 %v4228_v9 }
 0x38c   :  { %1048 = vmatpush.msrb.mxu0 %v906_v37  ;;  %v4227_v37 = vunpack.c.h.bf16 %v2969_v15  ;;  %v4235_v15 = vunpack.c.l.bf16 %v3211_v1 }
 0x38e   :  { %1049 = vmatpush.msrb.mxu0 %v905_v4  ;;  %v4230_v4 = vunpack.c.h.bf16 %v2980_v22  ;;  %v4237_v22 = vunpack.c.h.bf16 %v4186_v18  ;;  %v4243_v18 = vunpack.c.l.bf16 %v2853_v23 }
 0x38f   :  { %1050 = vmatmul.f32.vlgmr.msrb.gmra.mxu0 %v4212_v2  ;;  %v4232_v2 = vunpack.c.h.bf16 %v4180_v60 }
 0x393   :  { %982 = vmatmul.f32.gmra.mxu3 %v4214_v6  ;;  %v4234_v6 = vunpack.c.h.bf16 %v4182_v63 }
 0x397   :  { %1053 = vmatmul.f32.gmra.mxu0 %v4215_v17  ;;  %v4236_v17 = vunpack.c.h.bf16 %v4184_v44  ;;  %v4242_v44 = vunpack.c.h.bf16 %v4205_v42 }
 0x39b   :  { %985 = vmatmul.f32.gmra.mxu3 %v4217_v56  ;;  %v4238_v56 = vunpack.c.h.bf16 %v4193_v30  ;;  %v4244_v30 = vunpack.c.h.bf16 %v4210_v8 }
 0x39e   :  { %v938_v60 = vpop.f32.mrf.mxu3 }
 0x39f   :  { %1056 = vmatmul.f32.gmra.mxu0 %v4218_v29  ;;  %v4239_v29 = vunpack.c.l.bf16 %v3224_v59 }
 0x3a3   :  { %988 = vmatmul.f32.gmra.mxu3 %v4220_v32  ;;  %v4240_v32 = vunpack.c.h.bf16 %v4199_v38  ;;  %v4246_v38 = vunpack.c.h.bf16 %v4213_v26  ;;  %v4250_v26 = vunpack.c.h.bf16 %v4219_v36 }
 0x3a6   :  { %v941_v63 = vpop.f32.mrf.mxu3 }
 0x3a7   :  { %1059 = vmatmul.f32.gmra.mxu0 %v4221_v58  ;;  %v4241_v58 = vunpack.c.l.bf16 %v2837_v14 }
 0x3ab   :  { %991 = vmatmul.f32.gmra.mxu3 %v4223_v54 }
 0x3ae   :  { %v944_v54 = vpop.f32.mrf.mxu3 }
 0x3af   :  { %1062 = vmatmul.f32.gmra.mxu0 %v4224_v3 }
 0x3b3   :  { %994 = vmatmul.f32.gmra.mxu3 %v4226_v62  ;;  %v4245_v62 = vunpack.c.l.bf16 %v2865_v28 }
 0x3b6   :  { %v947_v3 = vpop.f32.mrf.mxu3 }
 0x3b7   :  { %1065 = vmatmul.f32.gmra.mxu0 %v4227_v37 }
 0x3bb   :  { %997 = vmatmul.f32.gmra.mxu3 %v4229_v11  ;;  %v4247_v11 = vunpack.c.l.bf16 %v2875_v34 }
 0x3be   :  { %v950_v37 = vpop.f32.mrf.mxu3 }
 0x3bf   :  { %1068 = vmatmul.f32.gmra.mxu0 %v4230_v4 }
 0x3c3   :  { %1000 = vmatmul.f32.gmra.mxu3 %v4231_v20  ;;  %v4248_v20 = vunpack.c.h.bf16 %v4216_v10 }
 0x3c6   :  { %v953_v8 = vpop.f32.mrf.mxu3 }
 0x3c7   :  { %1071 = vmatmul.f32.gmra.mxu0 %v4232_v2  ;;  %v4249_v2 = vunpack.c.l.bf16 %v2885_v40 }
 0x3cb   :  { %1003 = vmatmul.f32.gmra.mxu3 %v4233_v7 }
 0x3cf   :  { %1074 = vmatmul.f32.gmra.mxu0 %v4234_v6 }
 0x3d3   :  { %1006 = vmatmul.f32.gmra.mxu3 %v4235_v15  ;;  %v956_v15 = vpop.f32.mrf.mxu3 }
 0x3d7   :  { %1077 = vmatmul.f32.gmra.mxu0 %v4236_v17  ;;  %v4251_v17 = vunpack.c.l.bf16 %v2895_v46 }
 0x3db   :  { %1009 = vmatmul.f32.gmra.mxu3 %v4239_v29  ;;  %v4253_v29 = vunpack.c.l.bf16 %v2913_v61 }
 0x3df   :  { %1080 = vmatmul.f32.gmra.mxu0 %v4237_v22 }
 0x3e3   :  { %1012 = vmatmul.f32.gmra.mxu3 %v4241_v58 }
 0x3e7   :  { %1083 = vmatmul.f32.gmra.mxu0 %v4238_v56  ;;  %v4252_v56 = vunpack.c.h.bf16 %v4222_v48 }
 0x3eb   :  { %1015 = vmatmul.f32.gmra.mxu3 %v4243_v18 }
 0x3ef   :  { %1086 = vmatmul.f32.gmra.mxu0 %v4240_v32 }
 0x3f3   :  { %1018 = vmatmul.f32.gmra.mxu3 %v4245_v62 }
 0x3f7   :  { %1089 = vmatmul.f32.gmra.mxu0 %v4242_v44 }
 0x3fb   :  { %1021 = vmatmul.f32.gmra.mxu3 %v4247_v11 }
 0x3ff   :  { %1092 = vmatmul.f32.gmra.mxu0 %v4244_v30 }
 0x403   :  { %1024 = vmatmul.f32.gmra.mxu3 %v4249_v2 }
 0x407   :  { %1095 = vmatmul.f32.gmra.mxu0 %v4246_v38  ;;  %v4256_v38 = vunpack.c.h.bf16 %v3182_v12 }
 0x40b   :  { %1027 = vmatmul.f32.gmra.mxu3 %v4251_v17 }
 0x40c   :  { %v1051_v42 = vpop.f32.mrf.mxu0 }
 0x40d   :  { %v1052_v4 = vadd.f32 %v1051_v42, %v938_v60  ;;  %v959_v60 = vpop.f32.mrf.mxu3  ;;  %v4257_v42 = vunpack.c.h.bf16 %v3198_v27 }
 0x40f   :  { %1098 = vmatmul.f32.gmra.mxu0 %v4248_v20  ;;  %2409 = vmatmul.msk.f32.vlgmr.msrb.gmra.mxu1 %vm647_vm2, %v1052_v4  ;;  %v4258_v20 = vunpack.c.h.bf16 %v3211_v1 }
 0x413   :  { %1030 = vmatmul.f32.gmra.mxu3 %v4253_v29  ;;  %v4262_v29 = vunpack.c.h.bf16 %v2865_v28 }
 0x414   :  { %v1054_v7 = vpop.f32.mrf.mxu0 }
 0x415   :  { %v1055_v6 = vadd.f32 %v1054_v7, %v941_v63  ;;  %v4254_v63 = vunpack.c.h.bf16 %v4225_v0  ;;  %v962_v58 = vpop.f32.mrf.mxu3  ;;  %v4259_v7 = vunpack.c.h.bf16 %v3224_v59 }
 0x417   :  { %1101 = vmatmul.f32.gmra.mxu0 %v4250_v26  ;;  %2410 = vmatmul.msk.f32.gmra.mxu1 %vm647_vm2, %v1055_v6 }
 0x41c   :  { %v1057_v22 = vpop.f32.mrf.mxu0 }
 0x41d   :  { %v1058_v10 = vadd.f32 %v1057_v22, %v944_v54  ;;  %v4255_v54 = vunpack.c.h.bf16 %v4228_v9  ;;  %v965_v48 = vpop.f32.mrf.mxu3 }
 0x41f   :  { %1104 = vmatmul.f32.gmra.mxu0 %v4252_v56  ;;  %2411 = vmatmul.msk.f32.gmra.mxu1 %vm647_vm2, %v1058_v10  ;;  %v4261_v10 = vunpack.c.h.bf16 %v2853_v23 }
 0x424   :  { %v1060_v32 = vpop.f32.mrf.mxu0 }
 0x425   :  { %v1061_v36 = vadd.f32 %v1060_v32, %v947_v3  ;;  %v968_v0 = vpop.f32.mrf.mxu3 }
 0x427   :  { %1107 = vmatmul.f32.gmra.mxu0 %v4254_v63  ;;  %2412 = vmatmul.msk.f32.gmra.mxu1 %vm647_vm2, %v1061_v36  ;;  %v4263_v63 = vunpack.c.h.bf16 %v2875_v34 }
 0x42c   :  { %v1063_v44 = vpop.f32.mrf.mxu0 }
 0x42d   :  { %v1064_v18 = vadd.f32 %v1063_v44, %v950_v37  ;;  %v971_v9 = vpop.f32.mrf.mxu3 }
 0x42f   :  { %1110 = vmatmul.f32.gmra.mxu0 %v4255_v54  ;;  %2413 = vmatmul.msk.f32.gmra.mxu1 %vm647_vm2, %v1064_v18  ;;  %v4264_v18 = vunpack.c.h.bf16 %v2885_v40 }
 0x434   :  { %v1066_v30 = vpop.f32.mrf.mxu0 }
 0x435   :  { %v1067_v62 = vadd.f32 %v1066_v30, %v953_v8  ;;  %v974_v12 = vpop.f32.mrf.mxu3 }
 0x437   :  { %1113 = vmatmul.f32.gmra.mxu0 %v4256_v38  ;;  %2414 = vmatmul.msk.f32.gmra.mxu1 %vm647_vm2, %v1067_v62  ;;  %v4266_v38 = vunpack.c.h.bf16 %v2913_v61 }
 0x43c   :  { %v1069_v3 = vpop.f32.mrf.mxu0 }
 0x43d   :  { %v1070_v11 = vadd.f32 %v1069_v3, %v956_v15  ;;  %v977_v27 = vpop.f32.mrf.mxu3  ;;  %v4260_v15 = vunpack.c.h.bf16 %v2837_v14 }
 0x43f   :  { %1116 = vmatmul.f32.gmra.mxu0 %v4257_v42  ;;  %2415 = vmatmul.msk.f32.gmra.mxu1 %vm647_vm2, %v1070_v11 }
 0x444   :  { %v1072_v37 = vpop.f32.mrf.mxu0 }
 0x445   :  { %v1073_v4 = vadd.f32 %v1072_v37, %v959_v60  ;;  %v980_v1 = vpop.f32.mrf.mxu3 }
 0x447   :  { %1119 = vmatmul.f32.gmra.mxu0 %v4258_v20  ;;  %2416 = vmatmul.msk.f32.gmra.mxu1 %vm647_vm2, %v1073_v4 }
 0x44c   :  { %v1075_v8 = vpop.f32.mrf.mxu0 }
 0x44d   :  { %v1076_v2 = vadd.f32 %v1075_v8, %v962_v58  ;;  %v983_v59 = vpop.f32.mrf.mxu3 }
 0x44f   :  { %1122 = vmatmul.f32.gmra.mxu0 %v4259_v7  ;;  %2417 = vmatmul.msk.f32.gmra.mxu1 %vm647_vm2, %v1076_v2 }
 0x454   :  { %v1078_v6 = vpop.f32.mrf.mxu0 }
 0x455   :  { %v1079_v26 = vadd.f32 %v1078_v6, %v965_v48  ;;  %v986_v14 = vpop.f32.mrf.mxu3  ;;  %v4265_v48 = vunpack.c.h.bf16 %v2895_v46 }
 0x457   :  { %1125 = vmatmul.f32.gmra.mxu0 %v4260_v15  ;;  %2418 = vmatmul.msk.f32.gmra.mxu1 %vm647_vm2, %v1079_v26 }
 0x45c   :  { %v1081_v17 = vpop.f32.mrf.mxu0 }
 0x45d   :  { %v1082_v22 = vadd.f32 %v1081_v17, %v968_v0  ;;  %v989_v44 = vpop.f32.mrf.mxu3 }
 0x45f   :  { %1128 = vmatmul.f32.gmra.mxu0 %v4261_v10  ;;  %2419 = vmatmul.msk.f32.gmra.mxu1 %vm647_vm2, %v1082_v22 }
 0x464   :  { %v1084_v56 = vpop.f32.mrf.mxu0 }
 0x465   :  { %v1085_v60 = vadd.f32 %v1084_v56, %v971_v9  ;;  %v992_v30 = vpop.f32.mrf.mxu3 }
 0x467   :  { %1131 = vmatmul.f32.gmra.mxu0 %v4262_v29  ;;  %2420 = vmatmul.msk.f32.gmra.mxu1 %vm647_vm2, %v1085_v60 }
 0x46c   :  { %v1087_v32 = vpop.f32.mrf.mxu0 }
 0x46d   :  { %v1088_v36 = vadd.f32 %v1087_v32, %v974_v12  ;;  %v995_v0 = vpop.f32.mrf.mxu3 }
 0x46f   :  { %1134 = vmatmul.f32.gmra.mxu0 %v4263_v63  ;;  %2421 = vmatmul.msk.f32.gmra.mxu1 %vm647_vm2, %v1088_v36 }
 0x474   :  { %v1090_v23 = vpop.f32.mrf.mxu0 }
 0x475   :  { %v1091_v58 = vadd.f32 %v1090_v23, %v977_v27  ;;  %v998_v42 = vpop.f32.mrf.mxu3 }
 0x477   :  { %1137 = vmatmul.f32.gmra.mxu0 %v4264_v18  ;;  %2422 = vmatmul.msk.f32.gmra.mxu1 %vm647_vm2, %v1091_v58 }
 0x47c   :  { %v1093_v28 = vpop.f32.mrf.mxu0 }
 0x47d   :  { %v1094_v54 = vadd.f32 %v1093_v28, %v980_v1  ;;  %v1001_v12 = vpop.f32.mrf.mxu3 }
 0x47f   :  { %1140 = vmatmul.f32.gmra.mxu0 %v4265_v48  ;;  %2423 = vmatmul.msk.f32.gmra.mxu1 %vm647_vm2, %v1094_v54 }
 0x484   :  { %v1096_v34 = vpop.f32.mrf.mxu0 }
 0x485   :  { %v1097_v62 = vadd.f32 %v1096_v34, %v983_v59  ;;  %v1004_v27 = vpop.f32.mrf.mxu3 }
 0x487   :  { %1143 = vmatmul.f32.gmra.mxu0 %v4266_v38  ;;  %2424 = vmatmul.msk.f32.gmra.mxu1 %vm647_vm2, %v1097_v62 }
 0x48c   :  { %v1099_v40 = vpop.f32.mrf.mxu0  ;;  %v3504_v3 = vpop.f32.mrf.mxu1 }
 0x48d   :  { %v1100_v11 = vadd.f32 %v1099_v40, %v986_v14  ;;  %v1007_v1 = vpop.f32.mrf.mxu3 }
 0x48f   :  { %2425 = vmatmul.msk.f32.gmra.mxu1 %vm647_vm2, %v1100_v11 }
 0x494   :  { %v1102_v46 = vpop.f32.mrf.mxu0  ;;  %v3507_v9 = vpop.f32.mrf.mxu1 }
 0x495   :  { %v1103_v37 = vadd.f32 %v1102_v46, %v989_v44  ;;  %v1010_v59 = vpop.f32.mrf.mxu3 }
 0x497   :  { %2426 = vmatmul.msk.f32.gmra.mxu1 %vm647_vm2, %v1103_v37 }
 0x49c   :  { %v1105_v4 = vpop.f32.mrf.mxu0  ;;  %v3510_v20 = vpop.f32.mrf.mxu1 }
 0x49d   :  { %v1106_v61 = vadd.f32 %v1105_v4, %v992_v30  ;;  %v1013_v63 = vpop.f32.mrf.mxu3 }
 0x49f   :  { %2427 = vmatmul.msk.f32.gmra.mxu1 %vm647_vm2, %v1106_v61 }
 0x4a4   :  { %v1108_v8 = vpop.f32.mrf.mxu0  ;;  %v3513_v2 = vpop.f32.mrf.mxu1 }
 0x4a5   :  { %v1109_v7 = vadd.f32 %v1108_v8, %v995_v0  ;;  %v1016_v18 = vpop.f32.mrf.mxu3 }
 0x4a7   :  { %2428 = vmatmul.msk.f32.gmra.mxu1 %vm647_vm2, %v1109_v7 }
 0x4ac   :  { %v1111_v6 = vpop.f32.mrf.mxu0  ;;  %v3516_v26 = vpop.f32.mrf.mxu1 }
 0x4ad   :  { %v1112_v15 = vadd.f32 %v1111_v6, %v998_v42  ;;  %v1019_v30 = vpop.f32.mrf.mxu3 }
 0x4af   :  { %2429 = vmatmul.msk.f32.gmra.mxu1 %vm647_vm2, %v1112_v15 }
 0x4b4   :  { %v1114_v17 = vpop.f32.mrf.mxu0  ;;  %v3519_v22 = vpop.f32.mrf.mxu1 }
 0x4b5   :  { %v1115_v10 = vadd.f32 %v1114_v17, %v1001_v12  ;;  %v1022_v0 = vpop.f32.mrf.mxu3 }
 0x4b7   :  { %2430 = vmatmul.msk.f32.gmra.mxu1 %vm647_vm2, %v1115_v10 }
 0x4bc   :  { %v1117_v56 = vpop.f32.mrf.mxu0  ;;  %v3522_v60 = vpop.f32.mrf.mxu1 }
 0x4bd   :  { %v1118_v29 = vadd.f32 %v1117_v56, %v1004_v27  ;;  %v1025_v61 = vpop.f32.mrf.mxu3 }
 0x4bf   :  { %2431 = vmatmul.msk.f32.gmra.mxu1 %vm647_vm2, %v1118_v29 }
 0x4c4   :  { %v1120_v14 = vpop.f32.mrf.mxu0  ;;  %v1281_v32 = vpop.f32.mrf.mxu1 }
 0x4c5   :  { %v1121_v36 = vadd.f32 %v1120_v14, %v1007_v1  ;;  %v1028_v27 = vpop.f32.mrf.mxu3 }
 0x4c7   :  { %2432 = vmatmul.msk.f32.gmra.mxu1 %vm647_vm2, %v1121_v36 }
 0x4cc   :  { %v1123_v23 = vpop.f32.mrf.mxu0  ;;  %v1284_v58 = vpop.f32.mrf.mxu1 }
 0x4cd   :  { %v1124_v44 = vadd.f32 %v1123_v23, %v1010_v59  ;;  %v1031_v17 = vpop.f32.mrf.mxu3 }
 0x4cf   :  { %2433 = vmatmul.msk.f32.gmra.mxu1 %vm647_vm2, %v1124_v44 }
 0x4d4   :  { %v1126_v28 = vpop.f32.mrf.mxu0  ;;  %v1287_v54 = vpop.f32.mrf.mxu1 }
 0x4d5   :  { %v1127_v48 = vadd.f32 %v1126_v28, %v1013_v63 }
 0x4d7   :  { %2434 = vmatmul.msk.f32.gmra.mxu1 %vm647_vm2, %v1127_v48 }
 0x4dc   :  { %v1129_v34 = vpop.f32.mrf.mxu0  ;;  %v1290_v62 = vpop.f32.mrf.mxu1 }
 0x4dd   :  { %v1130_v38 = vadd.f32 %v1129_v34, %v1016_v18  ;;  %v1364_v34 = vadd.f32 %v1284_v58, %v2778_v45 }
 0x4df   :  { %2435 = vmatmul.msk.f32.gmra.mxu1 %vm647_vm2, %v1130_v38 }
 0x4e4   :  { %v1132_v40 = vpop.f32.mrf.mxu0  ;;  %v1293_v11 = vpop.f32.mrf.mxu1 }
 0x4e5   :  { %v1133_v42 = vadd.f32 %v1132_v40, %v1019_v30  ;;  %v1367_v18 = vadd.f32 %v1293_v11, %v2792_v50  ;;  %v4267_v40 = vld [vmem:[#allocation11_spill] sm:$0xff] }
 0x4e6   :  { %v1362_v11 = vadd.f32 %v3522_v60, %v4267_v40  ;;  %v4271_v60 = vld [vmem:[#allocation7_spill] sm:$0xff] }
 0x4e7   :  { %2436 = vmatmul.msk.f32.gmra.mxu1 %vm647_vm2, %v1133_v42  ;;  %v4269_v42 = vld [vmem:[#allocation9_spill] sm:$0xff] }
 0x4e8   :  { %v1360_v45 = vadd.f32 %v3516_v26, %v4269_v42  ;;  %v1394_v58 = vmax.f32 %v1362_v11, 0.0  ;;  %v4273_v26 = vld [vmem:[#allocation5_spill] sm:$0xff] }
 0x4ec   :  { %v1135_v46 = vpop.f32.mrf.mxu0  ;;  %v1296_v37 = vpop.f32.mrf.mxu1 }
 0x4ed   :  { %v1136_v4 = vadd.f32 %v1135_v46, %v1022_v0  ;;  %v1368_v23 = vadd.f32 %v1296_v37, %v2794_v51  ;;  %v1363_v51 = vadd.f32 %v1281_v32, %v2772_v43  ;;  %v4270_v43 = vld [vmem:[#allocation8_spill] sm:$0xff] }
 0x4ee   :  { %v1359_v32 = vadd.f32 %v3513_v2, %v4270_v43 }
 0x4ef   :  { %2437 = vmatmul.msk.f32.gmra.mxu1 %vm647_vm2, %v1136_v4  ;;  %v1400_v30 = vmax.f32 %v1368_v23, 0.0  ;;  %v1358_v4 = vadd.f32 %v3510_v20, %v4271_v60  ;;  %v4274_v23 = vld [vmem:[#allocation18_spill] sm:$0xff] }
 0x4f4   :  { %v1138_v12 = vpop.f32.mrf.mxu0  ;;  %v1299_v8 = vpop.f32.mrf.mxu1 }
 0x4f5   :  { %v1139_v7 = vadd.f32 %v1138_v12, %v1025_v61  ;;  %v1369_v36 = vadd.f32 %v1299_v8, %v2798_v53  ;;  %v1399_v53 = vmax.f32 %v1367_v18, 0.0  ;;  %v1392_v61 = vmax.f32 %v1360_v45, 0.0  ;;  %v1422_v45 = vld [vmem:[%s3997_s3 + $0x10] sm:$0xff] }
 0x4f6   :  { %v1391_v8 = vmax.f32 %v1359_v32, 0.0 }
 0x4f7   :  { %2438 = vmatmul.msk.f32.gmra.mxu1 %vm647_vm2, %v1139_v7  ;;  %v1401_v28 = vmax.f32 %v1369_v36, 0.0  ;;  %v1356_v7 = vadd.f32 %v3504_v3, %v4273_v26 }
 0x4fc   :  { %v1141_v6 = vpop.f32.mrf.mxu0  ;;  %v1302_v15 = vpop.f32.mrf.mxu1 }
 0x4fd   :  { %v1142_v1 = vadd.f32 %v1141_v6, %v1028_v27  ;;  %v1370_v56 = vadd.f32 %v1302_v15, %v2802_v55  ;;  %v1366_v55 = vadd.f32 %v1290_v62, %v2790_v49  ;;  %v1396_v49 = vmax.f32 %v1364_v34, 0.0  ;;  %v4268_v62 = vld [vmem:[#allocation10_spill] sm:$0xff] }
 0x4fe   :  { %v1390_v27 = vmax.f32 %v1358_v4, 0.0  ;;  %v1388_v15 = vmax.f32 %v1356_v7, 0.0 }
 0x4ff   :  { %2439 = vmatmul.msk.f32.gmra.mxu1 %vm647_vm2, %v1142_v1  ;;  %v1402_v44 = vmax.f32 %v1370_v56, 0.0  ;;  %v1398_v38 = vmax.f32 %v1366_v55, 0.0 }
 0x504   :  { %v1144_v10 = vpop.f32.mrf.mxu0  ;;  %v1305_v59 = vpop.f32.mrf.mxu1 }
 0x505   :  { %v1145_v29 = vadd.f32 %v1144_v10, %v1031_v17  ;;  %v1371_v14 = vadd.f32 %v1305_v59, %v2806_v57  ;;  %v1365_v57 = vadd.f32 %v1287_v54, %v2784_v47  ;;  %v1361_v47 = vadd.f32 %v3519_v22, %v4268_v62  ;;  %v4272_v22 = vld [vmem:[#allocation6_spill] sm:$0xff] }
 0x506   :  { %v1395_v54 = vmax.f32 %v1363_v51, 0.0  ;;  %v1357_v12 = vadd.f32 %v3507_v9, %v4272_v22  ;;  %v1421_v51 = vld [vmem:[%s3997_s3 + $0x8] sm:$0xff] }
 0x507   :  { %v1403_v63 = vmax.f32 %v1371_v14, 0.0  ;;  %2440 = vmatmul.msk.f32.gmra.mxu1 %vm647_vm2, %v1145_v29  ;;  %v1397_v0 = vmax.f32 %v1365_v57, 0.0  ;;  %v1393_v46 = vmax.f32 %v1361_v47, 0.0  ;;  %v1454_v11 = vunpack.c.l.bf16 %v1421_v51 }
 0x508   :  { %v1389_v2 = vmax.f32 %v1357_v12, 0.0 }
 0x509   :  { %1516 = vmatpush.msra.mxu2 %v1403_v63 }
 0x50b   :  { %1517 = vmatpush.msra.mxu2 %v1402_v44 }
 0x50c   :  { %v3539_v48 = vpop.f32.mrf.mxu1 }
 0x50d   :  { %1518 = vmatpush.msra.mxu2 %v1401_v28  ;;  %v1420_v28 = vld [vmem:[%s3997_s3] sm:$0xff]  ;;  %v1372_v26 = vadd.f32 %v3539_v48, %v4209_v33  ;;  %v1455_v33 = vunpack.c.h.bf16 %v1421_v51 }
 0x50e   :  { %v1452_v55 = vunpack.c.l.bf16 %v1420_v28 }
 0x50f   :  { %1519 = vmatpush.msra.mxu2 %v1400_v30  ;;  %v4275_v30 = vld [vmem:[#allocation15_spill] sm:$0xff] }
 0x511   :  { %1520 = vmatpush.msra.mxu2 %v1399_v53 }
 0x513   :  { %1521 = vmatpush.msra.mxu2 %v1398_v38 }
 0x514   :  { %v3545_v50 = vpop.f32.mrf.mxu1 }
 0x515   :  { %1522 = vmatpush.msra.mxu2 %v1397_v0  ;;  %v4276_v0 = vld [vmem:[#allocation13_spill] sm:$0xff] }
 0x517   :  { %1523 = vmatpush.msra.mxu2 %v1396_v49 }
 0x519   :  { %1524 = vmatpush.msra.mxu2 %v1395_v54 }
 0x51b   :  { %1525 = vmatpush.msra.mxu2 %v1394_v58 }
 0x51c   :  { %v3555_v37 = vpop.f32.mrf.mxu1 }
 0x51d   :  { %1526 = vmatpush.msra.mxu2 %v1393_v46  ;;  %v1374_v12 = vadd.f32 %v3555_v37, %v4207_v19  ;;  %v1453_v19 = vunpack.c.h.bf16 %v1420_v28  ;;  %v1432_v28 = vld [vmem:[%s3997_s3 + $0x60] sm:$0xff] }
 0x51f   :  { %1527 = vmatpush.msra.mxu2 %v1392_v61  ;;  %v1406_v7 = vmax.f32 %v1374_v12, 0.0  ;;  %v1438_v12 = vld [vmem:[%s3997_s3 + $0x90] sm:$0xff] }
 0x521   :  { %1528 = vmatpush.msra.mxu2 %v1391_v8  ;;  %v1373_v8 = vadd.f32 %v3545_v50, %v4208_v24  ;;  %v1425_v24 = vld [vmem:[%s3997_s3 + $0x28] sm:$0xff]  ;;  %v1426_v50 = vld [vmem:[%s3997_s3 + $0x30] sm:$0xff] }
 0x522   :  { %v1462_v48 = vunpack.c.l.bf16 %v1425_v24 }
 0x523   :  { %1529 = vmatpush.msra.mxu2 %v1390_v27  ;;  %v1405_v27 = vmax.f32 %v1373_v8, 0.0 }
 0x524   :  { %v1317_v6 = vpop.f32.mrf.mxu1 }
 0x525   :  { %1530 = vmatpush.msra.mxu2 %v1389_v2  ;;  %v1375_v61 = vadd.f32 %v1317_v6, %v4204_v16  ;;  %v1424_v16 = vld [vmem:[%s3997_s3 + $0x20] sm:$0xff]  ;;  %v1404_v2 = vmax.f32 %v1372_v26, 0.0  ;;  %v1457_v6 = vunpack.c.h.bf16 %v1422_v45  ;;  %v1744_v26 = vld [vmem:[%s3994_s0 + $0x10] sm:$0xff] }
 0x526   :  { %v1460_v37 = vunpack.c.l.bf16 %v1424_v16 }
 0x527   :  { %1531 = vmatpush.msra.mxu2 %v1388_v15  ;;  %v1464_v15 = vunpack.c.l.bf16 %v1426_v50 }
 0x528   :  { %1532 = vmatmul.f32.vlgmr.msra.gmra.mxu2 %v1452_v55 }
 0x52c   :  { %v1320_v1 = vpop.f32.mrf.mxu1 }
 0x530   :  { %1535 = vmatmul.f32.gmra.mxu2 %v1454_v11  ;;  %v1435_v11 = vld [vmem:[%s3997_s3 + $0x78] sm:$0xff] }
 0x534   :  { %v1323_v20 = vpop.f32.mrf.mxu1 }
 0x53c   :  { %v1326_v17 = vpop.f32.mrf.mxu1 }
 0x53d   :  { %v1378_v32 = vadd.f32 %v1326_v17, %v4201_v39 }
 0x53f   :  { %v1410_v4 = vmax.f32 %v1378_v32, 0.0 }
 0x544   :  { %v1329_v10 = vpop.f32.mrf.mxu1 }
 0x545   :  { %v1379_v58 = vadd.f32 %v1329_v10, %v4198_v25  ;;  %v1423_v25 = vld [vmem:[%s3997_s3 + $0x18] sm:$0xff]  ;;  %v1428_v10 = vld [vmem:[%s3997_s3 + $0x40] sm:$0xff] }
 0x546   :  { %v1458_v39 = vunpack.c.l.bf16 %v1423_v25  ;;  %v1469_v55 = vunpack.c.h.bf16 %v1428_v10 }
 0x547   :  { %v1411_v60 = vmax.f32 %v1379_v58, 0.0 }
 0x54c   :  { %v1332_v59 = vpop.f32.mrf.mxu1 }
 0x554   :  { %v1335_v56 = vpop.f32.mrf.mxu1 }
 0x555   :  { %v1381_v47 = vadd.f32 %v1335_v56, %v4196_v52  ;;  %v1377_v52 = vadd.f32 %v1323_v20, %v4202_v31  ;;  %v1459_v20 = vunpack.c.h.bf16 %v1423_v25  ;;  %v1468_v56 = vunpack.c.l.bf16 %v1428_v10 }
 0x557   :  { %v1413_v43 = vmax.f32 %v1381_v47, 0.0  ;;  %v1409_v22 = vmax.f32 %v1377_v52, 0.0  ;;  %v1777_v47 = vld [vmem:[%s4001_s7 + $0x18] sm:$0xff]  ;;  %v1779_v52 = vld [vmem:[%s4002_s8] sm:$0xff] }
 0x55c   :  { %v1338_v9 = vpop.f32.mrf.mxu1 }
 0x55d   :  { %v1382_v49 = vadd.f32 %v1338_v9, %v4195_v41  ;;  %v1456_v41 = vunpack.c.l.bf16 %v1422_v45  ;;  %v1429_v9 = vld [vmem:[%s3997_s3 + $0x48] sm:$0xff]  ;;  %v1436_v45 = vld [vmem:[%s3997_s3 + $0x80] sm:$0xff] }
 0x55e   :  { %v1484_v58 = vunpack.c.l.bf16 %v1436_v45 }
 0x55f   :  { %v1414_v42 = vmax.f32 %v1382_v49, 0.0  ;;  %1538 = vmatmul.f32.gmra.mxu2 %v1456_v41  ;;  %v1775_v41 = vld [vmem:[%s4001_s7 + $0x8] sm:$0xff] }
 0x564   :  { %v1341_v29 = vpop.f32.mrf.mxu1 }
 0x565   :  { %v1383_v40 = vadd.f32 %v1341_v29, %v4276_v0  ;;  %v1463_v29 = vunpack.c.h.bf16 %v1425_v24  ;;  %v1434_v0 = vld [vmem:[%s3997_s3 + $0x70] sm:$0xff] }
 0x567   :  { %v1415_v54 = vmax.f32 %v1383_v40, 0.0  ;;  %1541 = vmatmul.f32.gmra.mxu2 %v1458_v39  ;;  %v1743_v39 = vld [vmem:[%s3994_s0 + $0x8] sm:$0xff] }
 0x56c   :  { %v1344_v14 = vpop.f32.mrf.mxu1 }
 0x56d   :  { %v1384_v34 = vadd.f32 %v1344_v14, %v4191_v13  ;;  %v1380_v13 = vadd.f32 %v1332_v59, %v4197_v5  ;;  %v1376_v5 = vadd.f32 %v1320_v1, %v4203_v35  ;;  %v1407_v35 = vmax.f32 %v1375_v61, 0.0  ;;  %v1427_v1 = vld [vmem:[%s3997_s3 + $0x38] sm:$0xff] }
 0x56e   :  { %v1466_v17 = vunpack.c.l.bf16 %v1427_v1  ;;  %v1461_v59 = vunpack.c.h.bf16 %v1424_v16  ;;  %v1470_v14 = vunpack.c.l.bf16 %v1429_v9 }
 0x56f   :  { %v1416_v62 = vmax.f32 %v1384_v34, 0.0  ;;  %v1412_v46 = vmax.f32 %v1380_v13, 0.0  ;;  %v1408_v31 = vmax.f32 %v1376_v5, 0.0  ;;  %1544 = vmatmul.f32.gmra.mxu2 %v1460_v37  ;;  %v1433_v34 = vld [vmem:[%s3997_s3 + $0x68] sm:$0xff]  ;;  %v1776_v13 = vld [vmem:[%s4001_s7 + $0x10] sm:$0xff]  ;;  %v1742_v5 = vld [vmem:[%s3994_s0] sm:$0xff] }
 0x570   :  { %v1478_v51 = vunpack.c.l.bf16 %v1433_v34  ;;  %v1745_v37 = vld [vmem:[%s3994_s0 + $0x18] sm:$0xff] }
 0x574   :  { %v1347_v36 = vpop.f32.mrf.mxu1 }
 0x575   :  { %v1385_v57 = vadd.f32 %v1347_v36, %v4275_v30  ;;  %v1430_v36 = vld [vmem:[%s3997_s3 + $0x50] sm:$0xff]  ;;  %v1476_v30 = vunpack.c.l.bf16 %v1432_v28 }
 0x576   :  { %v1473_v40 = vunpack.c.h.bf16 %v1430_v36 }
 0x577   :  { %1547 = vmatmul.f32.gmra.mxu2 %v1462_v48 }
 0x57c   :  { %v1350_v63 = vpop.f32.mrf.mxu1 }
 0x57d   :  { %v1386_v44 = vadd.f32 %v1350_v63, %v4274_v23  ;;  %v1465_v63 = vunpack.c.h.bf16 %v1426_v50  ;;  %v1431_v23 = vld [vmem:[%s3997_s3 + $0x58] sm:$0xff] }
 0x57e   :  { %v1475_v49 = vunpack.c.h.bf16 %v1431_v23 }
 0x57f   :  { %v1418_v38 = vmax.f32 %v1386_v44, 0.0  ;;  %1550 = vmatmul.f32.gmra.mxu2 %v1464_v15  ;;  %v1467_v44 = vunpack.c.h.bf16 %v1427_v1  ;;  %v1746_v15 = vld [vmem:[%s3994_s0 + $0x20] sm:$0xff]  ;;  %v1441_v1 = vld [vmem:[%s3997_s3 + $0xa8] sm:$0xff] }
 0x584   :  { %v1353_v3 = vpop.f32.mrf.mxu1 }
 0x585   :  { %v1387_v18 = vadd.f32 %v1353_v3, %v4189_v21  ;;  %v1417_v21 = vmax.f32 %v1385_v57, 0.0  ;;  %v1472_v3 = vunpack.c.l.bf16 %v1430_v36  ;;  %v1782_v57 = vld [vmem:[%s4002_s8 + $0x18] sm:$0xff] }
 0x586   :  { %1891 = vmatpush.msra.mxu0 %v1782_v57 }
 0x587   :  { %v1419_v53 = vmax.f32 %v1387_v18, 0.0  ;;  %1553 = vmatmul.f32.gmra.mxu2 %v1466_v17  ;;  %v1474_v18 = vunpack.c.l.bf16 %v1431_v23 }
 0x589   :  { %1629 = vmatpush.msra.mxu3 %v1419_v53  ;;  %v1778_v53 = vld [vmem:[%s4001_s7 + $0x20] sm:$0x7f] }
 0x58a   :  { %2473 = vmatpush.msk.msra.mxu1 %vm2089_vm3, %v1778_v53 }
 0x58b   :  { %1630 = vmatpush.msra.mxu3 %v1418_v38  ;;  %v1471_v38 = vunpack.c.h.bf16 %v1429_v9  ;;  %v1747_v9 = vld [vmem:[%s3994_s0 + $0x28] sm:$0xff] }
 0x58c   :  { %2105 = vmatpush.msra.mxu1 %v1777_v47 }
 0x58d   :  { %1631 = vmatpush.msra.mxu3 %v1417_v21  ;;  %v1480_v21 = vunpack.c.l.bf16 %v1434_v0 }
 0x58e   :  { %2106 = vmatpush.msra.mxu1 %v1776_v13 }
 0x58f   :  { %1632 = vmatpush.msra.mxu3 %v1416_v62  ;;  %1556 = vmatmul.f32.gmra.mxu2 %v1468_v56  ;;  %v1482_v62 = vunpack.c.l.bf16 %v1435_v11  ;;  %v1489_v56 = vunpack.c.h.bf16 %v1438_v12 }
 0x590   :  { %2107 = vmatpush.msra.mxu1 %v1775_v41 }
 0x591   :  { %1633 = vmatpush.msra.mxu3 %v1415_v54  ;;  %v1781_v54 = vld [vmem:[%s4002_s8 + $0x10] sm:$0xff] }
 0x592   :  { %1892 = vmatpush.msra.mxu0 %v1781_v54 }
 0x593   :  { %1634 = vmatpush.msra.mxu3 %v1414_v42  ;;  %v1477_v42 = vunpack.c.h.bf16 %v1432_v28 }
 0x595   :  { %1635 = vmatpush.msra.mxu3 %v1413_v43  ;;  %v1780_v43 = vld [vmem:[%s4002_s8 + $0x8] sm:$0xff] }
 0x596   :  { %1893 = vmatpush.msra.mxu0 %v1780_v43  ;;  %v1446_v43 = vld [vmem:[%s3997_s3 + $0xd0] sm:$0xff] }
 0x597   :  { %1636 = vmatpush.msra.mxu3 %v1412_v46  ;;  %1559 = vmatmul.f32.gmra.mxu2 %v1470_v14  ;;  %v1479_v46 = vunpack.c.h.bf16 %v1433_v34  ;;  %v1749_v34 = vld [vmem:[%s3994_s0 + $0x38] sm:$0xff]  ;;  %v1504_v41 = vunpack.c.l.bf16 %v1446_v43 }
 0x598   :  { %1894 = vmatpush.msra.mxu0 %v1779_v52 }
 0x599   :  { %1637 = vmatpush.msra.mxu3 %v1411_v60  ;;  %v1774_v60 = vld [vmem:[%s4001_s7] sm:$0xff] }
 0x59a   :  { %2108 = vmatpush.msra.mxu1 %v1774_v60 }
 0x59b   :  { %1638 = vmatpush.msra.mxu3 %v1410_v4  ;;  %v1437_v4 = vld [vmem:[%s3997_s3 + $0x88] sm:$0xff]  ;;  %2474 = vmatmul.msk.f32.vlgmr.msra.gmra.mxu1 %vm1992_vm4, %v1742_v5  ;;  %v1752_v5 = vld [vmem:[%s3994_s0 + $0x50] sm:$0xff] }
 0x59c   :  { %v1486_v25 = vunpack.c.l.bf16 %v1437_v4 }
 0x59d   :  { %1639 = vmatpush.msra.mxu3 %v1409_v22  ;;  %v1481_v22 = vunpack.c.h.bf16 %v1434_v0 }
 0x59f   :  { %1640 = vmatpush.msra.mxu3 %v1408_v31  ;;  %1562 = vmatmul.f32.gmra.mxu2 %v1472_v3  ;;  %v1488_v31 = vunpack.c.l.bf16 %v1438_v12 }
 0x5a1   :  { %1641 = vmatpush.msra.mxu3 %v1407_v35  ;;  %v1483_v35 = vunpack.c.h.bf16 %v1435_v11  ;;  %v1495_v11 = vunpack.c.h.bf16 %v1441_v1 }
 0x5a3   :  { %1642 = vmatpush.msra.mxu3 %v1406_v7  ;;  %2475 = vmatmul.msk.f32.gmra.mxu1 %vm1992_vm4, %v1743_v39  ;;  %v1439_v7 = vld [vmem:[%s3997_s3 + $0x98] sm:$0xff] }
 0x5a4   :  { %v1490_v16 = vunpack.c.l.bf16 %v1439_v7  ;;  %v1491_v23 = vunpack.c.h.bf16 %v1439_v7 }
 0x5a5   :  { %1643 = vmatpush.msra.mxu3 %v1405_v27 }
 0x5a7   :  { %1644 = vmatpush.msra.mxu3 %v1404_v2  ;;  %1565 = vmatmul.f32.gmra.mxu2 %v1474_v18  ;;  %v1440_v2 = vld [vmem:[%s3997_s3 + $0xa0] sm:$0xff]  ;;  %v1443_v18 = vld [vmem:[%s3997_s3 + $0xb8] sm:$0xff] }
 0x5a8   :  { %1645 = vmatmul.f32.vlgmr.msra.gmra.mxu3 %v1453_v19  ;;  %v1485_v19 = vunpack.c.h.bf16 %v1436_v45  ;;  %v1492_v24 = vunpack.c.l.bf16 %v1440_v2  ;;  %v1498_v28 = vunpack.c.l.bf16 %v1443_v18  ;;  %v1493_v53 = vunpack.c.h.bf16 %v1440_v2 }
 0x5a9   :  { %v1499_v60 = vunpack.c.h.bf16 %v1443_v18 }
 0x5ab   :  { %v1533_v32 = vpop.f32.mrf.mxu2  ;;  %2476 = vmatmul.msk.f32.gmra.mxu1 %vm1992_vm4, %v1744_v26 }
 0x5af   :  { %1568 = vmatmul.f32.gmra.mxu2 %v1476_v30 }
 0x5b0   :  { %1648 = vmatmul.f32.gmra.mxu3 %v1455_v33 }
 0x5b3   :  { %v1536_v61 = vpop.f32.mrf.mxu2  ;;  %2477 = vmatmul.msk.f32.gmra.mxu1 %vm1992_vm4, %v1745_v37  ;;  %v1449_v37 = vld [vmem:[%s3997_s3 + $0xe8] sm:$0xff] }
 0x5b4   :  { %v1510_v2 = vunpack.c.l.bf16 %v1449_v37 }
 0x5b7   :  { %1571 = vmatmul.f32.gmra.mxu2 %v1478_v51 }
 0x5b8   :  { %1651 = vmatmul.f32.gmra.mxu3 %v1457_v6  ;;  %v1487_v6 = vunpack.c.h.bf16 %v1437_v4  ;;  %v1447_v4 = vld [vmem:[%s3997_s3 + $0xd8] sm:$0xff] }
 0x5bb   :  { %2478 = vmatmul.msk.f32.gmra.mxu1 %vm1992_vm4, %v1746_v15  ;;  %v1450_v15 = vld [vmem:[%s3997_s3 + $0xf0] sm:$0xff] }
 0x5bf   :  { %1574 = vmatmul.f32.gmra.mxu2 %v1480_v21 }
 0x5c0   :  { %1654 = vmatmul.f32.gmra.mxu3 %v1459_v20  ;;  %v1494_v20 = vunpack.c.l.bf16 %v1441_v1  ;;  %v1512_v1 = vunpack.c.l.bf16 %v1450_v15 }
 0x5c3   :  { %2479 = vmatmul.msk.f32.gmra.mxu1 %vm1992_vm4, %v1747_v9  ;;  %v1451_v9 = vld [vmem:[%s3997_s3 + $0xf8] sm:$0xff] }
 0x5c7   :  { %1577 = vmatmul.f32.gmra.mxu2 %v1482_v62  ;;  %v1445_v62 = vld [vmem:[%s3997_s3 + $0xc8] sm:$0xff] }
 0x5c8   :  { %1657 = vmatmul.f32.gmra.mxu3 %v1461_v59  ;;  %v1502_v47 = vunpack.c.l.bf16 %v1445_v62 }
 0x5cf   :  { %1580 = vmatmul.f32.gmra.mxu2 %v1484_v58  ;;  %v1751_v58 = vld [vmem:[%s3994_s0 + $0x48] sm:$0xff] }
 0x5d0   :  { %1660 = vmatmul.f32.gmra.mxu3 %v1463_v29  ;;  %v1442_v29 = vld [vmem:[%s3997_s3 + $0xb0] sm:$0xff] }
 0x5d1   :  { %v1496_v14 = vunpack.c.l.bf16 %v1442_v29  ;;  %v1497_v45 = vunpack.c.h.bf16 %v1442_v29  ;;  %v1514_v29 = vunpack.c.l.bf16 %v1451_v9 }
 0x5d7   :  { %1583 = vmatmul.f32.gmra.mxu2 %v1486_v25  ;;  %v1506_v25 = vunpack.c.l.bf16 %v1447_v4 }
 0x5d8   :  { %1663 = vmatmul.f32.gmra.mxu3 %v1465_v63 }
 0x5df   :  { %1586 = vmatmul.f32.gmra.mxu2 %v1488_v31  ;;  %v1753_v31 = vld [vmem:[%s3994_s0 + $0x58] sm:$0xff] }
 0x5e0   :  { %1666 = vmatmul.f32.gmra.mxu3 %v1467_v44  ;;  %v1748_v44 = vld [vmem:[%s3994_s0 + $0x30] sm:$0xff] }
 0x5e1   :  { %2480 = vmatmul.msk.f32.gmra.mxu1 %vm1992_vm4, %v1748_v44 }
 0x5e2   :  { %v1539_v8 = vpop.f32.mrf.mxu2 }
 0x5e7   :  { %1589 = vmatmul.f32.gmra.mxu2 %v1490_v16 }
 0x5e8   :  { %1669 = vmatmul.f32.gmra.mxu3 %v1469_v55 }
 0x5e9   :  { %2481 = vmatmul.msk.f32.gmra.mxu1 %vm1992_vm4, %v1749_v34 }
 0x5ea   :  { %v1542_v27 = vpop.f32.mrf.mxu2 }
 0x5ef   :  { %1592 = vmatmul.f32.gmra.mxu2 %v1492_v24 }
 0x5f0   :  { %1672 = vmatmul.f32.gmra.mxu3 %v1471_v38  ;;  %v1444_v38 = vld [vmem:[%s3997_s3 + $0xc0] sm:$0xff] }
 0x5f1   :  { %v1500_v51 = vunpack.c.l.bf16 %v1444_v38  ;;  %v1501_v12 = vunpack.c.h.bf16 %v1444_v38 }
 0x5f2   :  { %v1545_v48 = vpop.f32.mrf.mxu2 }
 0x5f7   :  { %1595 = vmatmul.f32.gmra.mxu2 %v1494_v20 }
 0x5f8   :  { %1675 = vmatmul.f32.gmra.mxu3 %v1473_v40 }
 0x5fa   :  { %v1548_v10 = vpop.f32.mrf.mxu2 }
 0x5ff   :  { %1598 = vmatmul.f32.gmra.mxu2 %v1496_v14 }
 0x600   :  { %1678 = vmatmul.f32.gmra.mxu3 %v1475_v49  ;;  %v1750_v49 = vld [vmem:[%s3994_s0 + $0x40] sm:$0xff] }
 0x601   :  { %2482 = vmatmul.msk.f32.gmra.mxu1 %vm1992_vm4, %v1750_v49 }
 0x602   :  { %v1551_v63 = vpop.f32.mrf.mxu2 }
 0x607   :  { %1601 = vmatmul.f32.gmra.mxu2 %v1498_v28 }
 0x608   :  { %1681 = vmatmul.f32.gmra.mxu3 %v1477_v42 }
 0x609   :  { %2483 = vmatmul.msk.f32.gmra.mxu1 %vm1992_vm4, %v1751_v58  ;;  %v1761_v58 = vld [vmem:[%s3994_s0 + $0x98] sm:$0xff] }
 0x60a   :  { %v1554_v30 = vpop.f32.mrf.mxu2 }
 0x60f   :  { %1604 = vmatmul.f32.gmra.mxu2 %v1500_v51  ;;  %v1513_v51 = vunpack.c.h.bf16 %v1450_v15  ;;  %v1766_v15 = vld [vmem:[%s3994_s0 + $0xc0] sm:$0xff] }
 0x610   :  { %1684 = vmatmul.f32.gmra.mxu3 %v1479_v46 }
 0x611   :  { %2484 = vmatmul.msk.f32.gmra.mxu1 %vm1992_vm4, %v1752_v5 }
 0x612   :  { %v1557_v40 = vpop.f32.mrf.mxu2 }
 0x617   :  { %1607 = vmatmul.f32.gmra.mxu2 %v1502_v47  ;;  %v1760_v47 = vld [vmem:[%s3994_s0 + $0x90] sm:$0xff] }
 0x618   :  { %1687 = vmatmul.f32.gmra.mxu3 %v1481_v22  ;;  %v3781_v18 = vpop.f32.mrf.mxu1 }
 0x619   :  { %2485 = vmatmul.msk.f32.gmra.mxu1 %vm1992_vm4, %v1753_v31 }
 0x61a   :  { %v1560_v13 = vpop.f32.mrf.mxu2 }
 0x61f   :  { %1610 = vmatmul.f32.gmra.mxu2 %v1504_v41 }
 0x620   :  { %1690 = vmatmul.f32.gmra.mxu3 %v1483_v35  ;;  %v3788_v34 = vpop.f32.mrf.mxu1 }
 0x622   :  { %v1563_v46 = vpop.f32.mrf.mxu2 }
 0x627   :  { %1613 = vmatmul.f32.gmra.mxu2 %v1506_v25 }
 0x628   :  { %1693 = vmatmul.f32.gmra.mxu3 %v1485_v19  ;;  %v1754_v19 = vld [vmem:[%s3994_s0 + $0x60] sm:$0xff] }
 0x629   :  { %2486 = vmatmul.msk.f32.gmra.mxu1 %vm1992_vm4, %v1754_v19 }
 0x62a   :  { %v1566_v22 = vpop.f32.mrf.mxu2 }
 0x62b   :  { %v1646_v33 = vpop.f32.mrf.mxu3 }
 0x62c   :  { %v1647_v50 = vadd.f32 %v1646_v33, %v1533_v32 }
 0x62e   :  { %2441 = vmatmul.msk.f32.vlgmr.msra.gmra.mxu0 %vm647_vm2, %v1647_v50  ;;  %v1505_v50 = vunpack.c.h.bf16 %v1446_v43 }
 0x630   :  { %1696 = vmatmul.f32.gmra.mxu3 %v1487_v6  ;;  %v1755_v6 = vld [vmem:[%s3994_s0 + $0x68] sm:$0xff] }
 0x631   :  { %2487 = vmatmul.msk.f32.gmra.mxu1 %vm1992_vm4, %v1755_v6 }
 0x632   :  { %v1569_v7 = vpop.f32.mrf.mxu2 }
 0x633   :  { %v1649_v17 = vpop.f32.mrf.mxu3 }
 0x634   :  { %v1650_v59 = vadd.f32 %v1649_v17, %v1536_v61 }
 0x636   :  { %2442 = vmatmul.msk.f32.gmra.mxu0 %vm647_vm2, %v1650_v59  ;;  %v1507_v59 = vunpack.c.h.bf16 %v1447_v4 }
 0x638   :  { %1699 = vmatmul.f32.gmra.mxu3 %v1489_v56  ;;  %v1756_v56 = vld [vmem:[%s3994_s0 + $0x70] sm:$0xff] }
 0x639   :  { %2488 = vmatmul.msk.f32.gmra.mxu1 %vm1992_vm4, %v1756_v56  ;;  %v1767_v56 = vld [vmem:[%s3994_s0 + $0xc8] sm:$0xff] }
 0x63a   :  { %v1572_v33 = vpop.f32.mrf.mxu2 }
 0x63b   :  { %v1652_v36 = vpop.f32.mrf.mxu3 }
 0x63c   :  { %v1653_v3 = vadd.f32 %v1652_v36, %v1539_v8  ;;  %v1448_v8 = vld [vmem:[%s3997_s3 + $0xe0] sm:$0xff] }
 0x63d   :  { %v1508_v35 = vunpack.c.l.bf16 %v1448_v8 }
 0x63e   :  { %2443 = vmatmul.msk.f32.gmra.mxu0 %vm647_vm2, %v1653_v3  ;;  %v1509_v3 = vunpack.c.h.bf16 %v1448_v8 }
 0x63f   :  { %1616 = vmatmul.f32.gmra.mxu2 %v1508_v35 }
 0x640   :  { %1702 = vmatmul.f32.gmra.mxu3 %v1491_v23  ;;  %v1757_v23 = vld [vmem:[%s3994_s0 + $0x78] sm:$0xff] }
 0x641   :  { %2489 = vmatmul.msk.f32.gmra.mxu1 %vm1992_vm4, %v1757_v23 }
 0x642   :  { %v1575_v17 = vpop.f32.mrf.mxu2 }
 0x643   :  { %v1655_v55 = vpop.f32.mrf.mxu3 }
 0x644   :  { %v1656_v57 = vadd.f32 %v1655_v55, %v1542_v27  ;;  %v1503_v27 = vunpack.c.h.bf16 %v1445_v62  ;;  %v1511_v55 = vunpack.c.h.bf16 %v1449_v37  ;;  %v1515_v62 = vunpack.c.h.bf16 %v1451_v9 }
 0x646   :  { %2444 = vmatmul.msk.f32.gmra.mxu0 %vm647_vm2, %v1656_v57  ;;  %v1758_v57 = vld [vmem:[%s3994_s0 + $0x80] sm:$0xff] }
 0x647   :  { %1619 = vmatmul.f32.gmra.mxu2 %v1510_v2  ;;  %v1765_v2 = vld [vmem:[%s3994_s0 + $0xb8] sm:$0xff] }
 0x648   :  { %1705 = vmatmul.f32.gmra.mxu3 %v1493_v53 }
 0x649   :  { %2490 = vmatmul.msk.f32.gmra.mxu1 %vm1992_vm4, %v1758_v57  ;;  %v1769_v57 = vld [vmem:[%s3994_s0 + $0xd8] sm:$0xff] }
 0x64a   :  { %v1578_v36 = vpop.f32.mrf.mxu2 }
 0x64b   :  { %v1658_v0 = vpop.f32.mrf.mxu3 }
 0x64c   :  { %v1659_v21 = vadd.f32 %v1658_v0, %v1545_v48 }
 0x64e   :  { %2445 = vmatmul.msk.f32.gmra.mxu0 %vm647_vm2, %v1659_v21 }
 0x64f   :  { %1622 = vmatmul.f32.gmra.mxu2 %v1512_v1 }
 0x650   :  { %1708 = vmatmul.f32.gmra.mxu3 %v1495_v11  ;;  %v3795_v11 = vpop.f32.mrf.mxu1 }
 0x653   :  { %v1661_v54 = vpop.f32.mrf.mxu3 }
 0x654   :  { %v1662_v42 = vadd.f32 %v1661_v54, %v1548_v10 }
 0x656   :  { %2446 = vmatmul.msk.f32.gmra.mxu0 %vm647_vm2, %v1662_v42 }
 0x657   :  { %1625 = vmatmul.f32.gmra.mxu2 %v1514_v29 }
 0x658   :  { %1711 = vmatmul.f32.gmra.mxu3 %v1497_v45  ;;  %v3802_v42 = vpop.f32.mrf.mxu1 }
 0x65b   :  { %v1664_v32 = vpop.f32.mrf.mxu3 }
 0x65c   :  { %v1665_v52 = vadd.f32 %v1664_v32, %v1551_v63 }
 0x65e   :  { %2447 = vmatmul.msk.f32.gmra.mxu0 %vm647_vm2, %v1665_v52 }
 0x660   :  { %1714 = vmatmul.f32.gmra.mxu3 %v1499_v60  ;;  %v3811_v32 = vpop.f32.mrf.mxu1  ;;  %v1762_v60 = vld [vmem:[%s3994_s0 + $0xa0] sm:$0xff] }
 0x663   :  { %v1667_v61 = vpop.f32.mrf.mxu3 }
 0x664   :  { %v1668_v39 = vadd.f32 %v1667_v61, %v1554_v30  ;;  %v1581_v30 = vpop.f32.mrf.mxu2 }
 0x666   :  { %2448 = vmatmul.msk.f32.gmra.mxu0 %vm647_vm2, %v1668_v39  ;;  %v1763_v39 = vld [vmem:[%s3994_s0 + $0xa8] sm:$0xff] }
 0x668   :  { %1717 = vmatmul.f32.gmra.mxu3 %v1501_v12  ;;  %v3820_v4 = vpop.f32.mrf.mxu1 }
 0x66b   :  { %v1670_v26 = vpop.f32.mrf.mxu3 }
 0x66c   :  { %v1671_v16 = vadd.f32 %v1670_v26, %v1557_v40  ;;  %v1584_v0 = vpop.f32.mrf.mxu2  ;;  %v1759_v40 = vld [vmem:[%s3994_s0 + $0x88] sm:$0xff] }
 0x66d   :  { %2491 = vmatmul.msk.f32.gmra.mxu1 %vm1992_vm4, %v1759_v40 }
 0x66e   :  { %2449 = vmatmul.msk.f32.gmra.mxu0 %vm647_vm2, %v1671_v16 }
 0x670   :  { %1720 = vmatmul.f32.gmra.mxu3 %v1503_v27  ;;  %v3829_v31 = vpop.f32.mrf.mxu1 }
 0x673   :  { %v1673_v24 = vpop.f32.mrf.mxu3 }
 0x674   :  { %v1674_v48 = vadd.f32 %v1673_v24, %v1560_v13  ;;  %v1587_v54 = vpop.f32.mrf.mxu2 }
 0x675   :  { %2492 = vmatmul.msk.f32.gmra.mxu1 %vm1992_vm4, %v1760_v47 }
 0x676   :  { %2450 = vmatmul.msk.f32.gmra.mxu0 %vm647_vm2, %v1674_v48 }
 0x678   :  { %1723 = vmatmul.f32.gmra.mxu3 %v1505_v50  ;;  %v3838_v27 = vpop.f32.mrf.mxu1 }
 0x67b   :  { %v1676_v20 = vpop.f32.mrf.mxu3 }
 0x67c   :  { %v1677_v10 = vadd.f32 %v1676_v20, %v1563_v46  ;;  %v1590_v43 = vpop.f32.mrf.mxu2 }
 0x67d   :  { %2493 = vmatmul.msk.f32.gmra.mxu1 %vm1992_vm4, %v1761_v58 }
 0x67e   :  { %2451 = vmatmul.msk.f32.gmra.mxu0 %vm647_vm2, %v1677_v10 }
 0x680   :  { %1726 = vmatmul.f32.gmra.mxu3 %v1507_v59  ;;  %v2134_v48 = vpop.f32.mrf.mxu1 }
 0x683   :  { %v1679_v14 = vpop.f32.mrf.mxu3 }
 0x684   :  { %v1680_v63 = vadd.f32 %v1679_v14, %v1566_v22  ;;  %v1593_v61 = vpop.f32.mrf.mxu2 }
 0x685   :  { %2494 = vmatmul.msk.f32.gmra.mxu1 %vm1992_vm4, %v1762_v60 }
 0x686   :  { %2452 = vmatmul.msk.f32.gmra.mxu0 %vm647_vm2, %v1680_v63 }
 0x688   :  { %1729 = vmatmul.f32.gmra.mxu3 %v1509_v3  ;;  %v1768_v3 = vld [vmem:[%s3994_s0 + $0xd0] sm:$0xff] }
 0x68b   :  { %v1682_v44 = vpop.f32.mrf.mxu3 }
 0x68c   :  { %v1683_v28 = vadd.f32 %v1682_v44, %v1569_v7  ;;  %v1596_v26 = vpop.f32.mrf.mxu2  ;;  %v1764_v7 = vld [vmem:[%s3994_s0 + $0xb0] sm:$0xff] }
 0x68d   :  { %2495 = vmatmul.msk.f32.gmra.mxu1 %vm1992_vm4, %v1763_v39 }
 0x68e   :  { %2453 = vmatmul.msk.f32.gmra.mxu0 %vm647_vm2, %v1683_v28 }
 0x690   :  { %1732 = vmatmul.f32.gmra.mxu3 %v1511_v55 }
 0x693   :  { %v1685_v53 = vpop.f32.mrf.mxu3 }
 0x694   :  { %v1686_v38 = vadd.f32 %v1685_v53, %v1572_v33  ;;  %v1599_v24 = vpop.f32.mrf.mxu2 }
 0x695   :  { %2496 = vmatmul.msk.f32.gmra.mxu1 %vm1992_vm4, %v1764_v7 }
 0x696   :  { %2454 = vmatmul.msk.f32.gmra.mxu0 %vm647_vm2, %v1686_v38 }
 0x698   :  { %1735 = vmatmul.f32.gmra.mxu3 %v1513_v51 }
 0x69b   :  { %v1688_v21 = vpop.f32.mrf.mxu3 }
 0x69c   :  { %v1689_v49 = vadd.f32 %v1688_v21, %v1575_v17  ;;  %v1602_v1 = vpop.f32.mrf.mxu2  ;;  %v3854_v17 = vpop.f32.mrf.mxu1  ;;  %v1770_v21 = vld [vmem:[%s3994_s0 + $0xe0] sm:$0xff] }
 0x69d   :  { %2497 = vmatmul.msk.f32.gmra.mxu1 %vm1992_vm4, %v1765_v2 }
 0x69e   :  { %2455 = vmatmul.msk.f32.gmra.mxu0 %vm647_vm2, %v1689_v49 }
 0x6a0   :  { %1738 = vmatmul.f32.gmra.mxu3 %v1515_v62 }
 0x6a3   :  { %v1691_v13 = vpop.f32.mrf.mxu3 }
 0x6a4   :  { %v1692_v45 = vadd.f32 %v1691_v13, %v1578_v36  ;;  %v3863_v29 = vpop.f32.mrf.mxu1  ;;  %v1605_v36 = vpop.f32.mrf.mxu2 }
 0x6a5   :  { %2498 = vmatmul.msk.f32.gmra.mxu1 %vm1992_vm4, %v1766_v15 }
 0x6a6   :  { %2456 = vmatmul.msk.f32.gmra.mxu0 %vm647_vm2, %v1692_v45  ;;  %v1771_v45 = vld [vmem:[%s3994_s0 + $0xe8] sm:$0xff] }
 0x6ab   :  { %v3809_v41 = vpop.f32.mrf.mxu0  ;;  %v1694_v46 = vpop.f32.mrf.mxu3 }
 0x6ac   :  { %v1695_v52 = vadd.f32 %v1694_v46, %v1581_v30  ;;  %v3872_v44 = vpop.f32.mrf.mxu1  ;;  %v1608_v30 = vpop.f32.mrf.mxu2 }
 0x6ad   :  { %2499 = vmatmul.msk.f32.gmra.mxu1 %vm1992_vm4, %v1767_v56 }
 0x6ae   :  { %2457 = vmatmul.msk.f32.gmra.mxu0 %vm647_vm2, %v1695_v52 }
 0x6b3   :  { %v3818_v5 = vpop.f32.mrf.mxu0  ;;  %v1697_v25 = vpop.f32.mrf.mxu3 }
 0x6b4   :  { %v1698_v22 = vadd.f32 %v1697_v25, %v1584_v0  ;;  %v2146_v38 = vpop.f32.mrf.mxu1  ;;  %v1611_v49 = vpop.f32.mrf.mxu2  ;;  %v1772_v25 = vld [vmem:[%s3994_s0 + $0xf0] sm:$0xff] }
 0x6b5   :  { %2500 = vmatmul.msk.f32.gmra.mxu1 %vm1992_vm4, %v1768_v3 }
 0x6b6   :  { %2458 = vmatmul.msk.f32.gmra.mxu0 %vm647_vm2, %v1698_v22 }
 0x6bb   :  { %v3827_v12 = vpop.f32.mrf.mxu0  ;;  %v1700_v8 = vpop.f32.mrf.mxu3 }
 0x6bc   :  { %v1701_v35 = vadd.f32 %v1700_v8, %v1587_v54  ;;  %v2149_v47 = vpop.f32.mrf.mxu1  ;;  %v1614_v58 = vpop.f32.mrf.mxu2 }
 0x6bd   :  { %2501 = vmatmul.msk.f32.gmra.mxu1 %vm1992_vm4, %v1769_v57 }
 0x6be   :  { %2459 = vmatmul.msk.f32.gmra.mxu0 %vm647_vm2, %v1701_v35 }
 0x6c3   :  { %v3836_v16 = vpop.f32.mrf.mxu0  ;;  %v1703_v19 = vpop.f32.mrf.mxu3 }
 0x6c4   :  { %v1704_v37 = vadd.f32 %v1703_v19, %v1590_v43  ;;  %v2152_v46 = vpop.f32.mrf.mxu1  ;;  %v1617_v8 = vpop.f32.mrf.mxu2 }
 0x6c5   :  { %2502 = vmatmul.msk.f32.gmra.mxu1 %vm1992_vm4, %v1770_v21 }
 0x6c6   :  { %2460 = vmatmul.msk.f32.gmra.mxu0 %vm647_vm2, %v1704_v37 }
 0x6cb   :  { %v3845_v33 = vpop.f32.mrf.mxu0  ;;  %v1706_v50 = vpop.f32.mrf.mxu3 }
 0x6cc   :  { %v1707_v6 = vadd.f32 %v1706_v50, %v1593_v61  ;;  %v2155_v22 = vpop.f32.mrf.mxu1 }
 0x6cd   :  { %2503 = vmatmul.msk.f32.gmra.mxu1 %vm1992_vm4, %v1771_v45 }
 0x6ce   :  { %2461 = vmatmul.msk.f32.gmra.mxu0 %vm647_vm2, %v1707_v6 }
 0x6d3   :  { %v3852_v20 = vpop.f32.mrf.mxu0  ;;  %v1709_v10 = vpop.f32.mrf.mxu3 }
 0x6d4   :  { %v1710_v59 = vadd.f32 %v1709_v10, %v1596_v26  ;;  %v1773_v26 = vld [vmem:[%s3994_s0 + $0xf8] sm:$0xff]  ;;  %v2158_v37 = vpop.f32.mrf.mxu1 }
 0x6d5   :  { %2504 = vmatmul.msk.f32.gmra.mxu1 %vm1992_vm4, %v1772_v25 }
 0x6d6   :  { %2462 = vmatmul.msk.f32.gmra.mxu0 %vm647_vm2, %v1710_v59 }
 0x6db   :  { %v3861_v9 = vpop.f32.mrf.mxu0  ;;  %v1712_v14 = vpop.f32.mrf.mxu3 }
 0x6dc   :  { %v1713_v63 = vadd.f32 %v1712_v14, %v1599_v24  ;;  %v1620_v24 = vpop.f32.mrf.mxu2 }
 0x6dd   :  { %2505 = vmatmul.msk.f32.gmra.mxu1 %vm1992_vm4, %v1773_v26 }
 0x6de   :  { %2463 = vmatmul.msk.f32.gmra.mxu0 %vm647_vm2, %v1713_v63 }
 0x6e3   :  { %v3870_v23 = vpop.f32.mrf.mxu0  ;;  %v1715_v28 = vpop.f32.mrf.mxu3 }
 0x6e4   :  { %v1716_v55 = vadd.f32 %v1715_v28, %v1602_v1  ;;  %v1623_v1 = vpop.f32.mrf.mxu2  ;;  %v3907_v28 = vld [vmem:[%s4003_s9] ss:$0 sm:$0xff] }
 0x6e6   :  { %2464 = vmatmul.msk.f32.gmra.mxu0 %vm647_vm2, %v1716_v55 }
 0x6ea   :  { %v2161_v15 = vpop.f32.mrf.mxu1 }
 0x6eb   :  { %v1920_v53 = vpop.f32.mrf.mxu0  ;;  %v1718_v0 = vpop.f32.mrf.mxu3 }
 0x6ec   :  { %v3879_v51 = vadd.f32 %v2134_v48, %v1920_v53  ;;  %v1719_v40 = vadd.f32 %v1718_v0, %v1605_v36  ;;  %v1626_v63 = vpop.f32.mrf.mxu2 }
 0x6ee   :  { %2465 = vmatmul.msk.f32.gmra.mxu0 %vm647_vm2, %v1719_v40 }
 0x6f2   :  { %v2164_v14 = vpop.f32.mrf.mxu1 }
 0x6f3   :  { %v1923_v62 = vpop.f32.mrf.mxu0  ;;  %v1721_v54 = vpop.f32.mrf.mxu3 }
 0x6f4   :  { %v1722_v13 = vadd.f32 %v1721_v54, %v1608_v30 }
 0x6f6   :  { %2466 = vmatmul.msk.f32.gmra.mxu0 %vm647_vm2, %v1722_v13 }
 0x6fb   :  { %v1926_v43 = vpop.f32.mrf.mxu0  ;;  %v1724_v52 = vpop.f32.mrf.mxu3 }
 0x6fc   :  { %v1725_v60 = vadd.f32 %v1724_v52, %v1611_v49  ;;  %v2141_v45 = vadd.f32 %v3863_v29, %v1926_v43  ;;  %v2132_v29 = vadd.f32 %v3838_v27, %v3870_v23 }
 0x6fe   :  { %2467 = vmatmul.msk.f32.gmra.mxu0 %vm647_vm2, %v1725_v60  ;;  %v2217_v26 = vadd.f32 %v3907_v28, %v2132_v29  ;;  %v2274_v29 = vld [vmem:[%s3998_s4] sm:$0xff] }
 0x703   :  { %v1929_v61 = vpop.f32.mrf.mxu0  ;;  %v1727_v39 = vpop.f32.mrf.mxu3 }
 0x704   :  { %v1728_v35 = vadd.f32 %v1727_v39, %v1614_v58  ;;  %v2144_v49 = vadd.f32 %v3872_v44, %v1929_v61  ;;  %v2220_v44 = vadd.f32 %v3907_v28, %v2141_v45 }
 0x706   :  { %2468 = vmatmul.msk.f32.gmra.mxu0 %vm647_vm2, %v1728_v35  ;;  %v2221_v52 = vadd.f32 %v3907_v28, %v2144_v49  ;;  %v2126_v35 = vadd.f32 %v3820_v4, %v3852_v20  ;;  %v2249_v20 = vmax.f32 %v2217_v26, 0.0 }
 0x708   :  { %v2253_v39 = vmax.f32 %v2221_v52, 0.0  ;;  %v2215_v4 = vadd.f32 %v3907_v28, %v2126_v35 }
 0x70b   :  { %v1932_v7 = vpop.f32.mrf.mxu0  ;;  %v1730_v19 = vpop.f32.mrf.mxu3 }
 0x70c   :  { %v1731_v2 = vadd.f32 %v1730_v19, %v1617_v8  ;;  %v2147_v0 = vadd.f32 %v2146_v38, %v1932_v7  ;;  %v2138_v38 = vadd.f32 %v3854_v17, %v1923_v62  ;;  %v2129_v17 = vadd.f32 %v3829_v31, %v3861_v9 }
 0x70d   :  { %v2218_v62 = vadd.f32 %v3907_v28, %v3879_v51  ;;  %v2252_v8 = vmax.f32 %v2220_v44, 0.0  ;;  %v2120_v51 = vadd.f32 %v3802_v42, %v3836_v16  ;;  %v2111_v16 = vadd.f32 %v3781_v18, %v3809_v41 }
 0x70e   :  { %2469 = vmatmul.msk.f32.gmra.mxu0 %vm647_vm2, %v1731_v2  ;;  %v2222_v58 = vadd.f32 %v3907_v28, %v2147_v0  ;;  %v2219_v43 = vadd.f32 %v3907_v28, %v2138_v38  ;;  %v2216_v31 = vadd.f32 %v3907_v28, %v2129_v17  ;;  %v2117_v2 = vadd.f32 %v3795_v11, %v3827_v12 }
 0x70f   :  { %v2250_v9 = vmax.f32 %v2218_v62, 0.0 }
 0x710   :  { %v2254_v61 = vmax.f32 %v2222_v58, 0.0  ;;  %v2251_v7 = vmax.f32 %v2219_v43, 0.0 }
 0x713   :  { %v1935_v48 = vpop.f32.mrf.mxu0  ;;  %v1733_v50 = vpop.f32.mrf.mxu3 }
 0x714   :  { %v1734_v6 = vadd.f32 %v1733_v50, %v1620_v24  ;;  %v2150_v55 = vadd.f32 %v2149_v47, %v1935_v48  ;;  %v2248_v48 = vmax.f32 %v2216_v31, 0.0  ;;  %v2247_v50 = vmax.f32 %v2215_v4, 0.0 }
 0x716   :  { %2470 = vmatmul.msk.f32.gmra.mxu0 %vm647_vm2, %v1734_v6  ;;  %v2223_v54 = vadd.f32 %v3907_v28, %v2150_v55 }
 0x718   :  { %v2255_v60 = vmax.f32 %v2223_v54, 0.0 }
 0x71b   :  { %v1938_v10 = vpop.f32.mrf.mxu0  ;;  %v1736_v59 = vpop.f32.mrf.mxu3 }
 0x71c   :  { %v1737_v56 = vadd.f32 %v1736_v59, %v1623_v1  ;;  %v2153_v36 = vadd.f32 %v2152_v46, %v1938_v10  ;;  %v2167_v46 = vpop.f32.mrf.mxu1 }
 0x71e   :  { %2471 = vmatmul.msk.f32.gmra.mxu0 %vm647_vm2, %v1737_v56  ;;  %v2224_v40 = vadd.f32 %v3907_v28, %v2153_v36 }
 0x720   :  { %v2256_v47 = vmax.f32 %v2224_v40, 0.0 }
 0x723   :  { %v1941_v3 = vpop.f32.mrf.mxu0  ;;  %v1739_v57 = vpop.f32.mrf.mxu3 }
 0x724   :  { %v2156_v30 = vadd.f32 %v2155_v22, %v1941_v3  ;;  %v1740_v53 = vadd.f32 %v1739_v57, %v1626_v63  ;;  %v2170_v23 = vpop.f32.mrf.mxu1 }
 0x726   :  { %v2225_v21 = vadd.f32 %v3907_v28, %v2156_v30  ;;  %2472 = vmatmul.msk.f32.gmra.mxu0 %vm647_vm2, %v1740_v53 }
 0x728   :  { %v2257_v13 = vmax.f32 %v2225_v21, 0.0 }
 0x72a   :  { %2278 = vmatpush.msrb.mxu2 %v2257_v13 }
 0x72b   :  { %v1944_v25 = vpop.f32.mrf.mxu0 }
 0x72c   :  { %2279 = vmatpush.msrb.mxu2 %v2256_v47  ;;  %v3918_v22 = vadd.f32 %v2158_v37, %v1944_v25  ;;  %v2123_v37 = vadd.f32 %v3811_v32, %v3845_v33  ;;  %v2114_v32 = vadd.f32 %v3788_v34, %v3818_v5  ;;  %v2213_v33 = vadd.f32 %v3907_v28, %v2120_v51  ;;  %v2173_v12 = vpop.f32.mrf.mxu1 }
 0x72d   :  { %v2210_v34 = vadd.f32 %v3907_v28, %v2111_v16 }
 0x72e   :  { %2280 = vmatpush.msrb.mxu2 %v2255_v60  ;;  %v2214_v24 = vadd.f32 %v3907_v28, %v2123_v37  ;;  %v2211_v1 = vadd.f32 %v3907_v28, %v2114_v32  ;;  %v2245_v10 = vmax.f32 %v2213_v33, 0.0 }
 0x72f   :  { %v2242_v18 = vmax.f32 %v2210_v34, 0.0 }
 0x730   :  { %2281 = vmatpush.msrb.mxu2 %v2254_v61  ;;  %v2246_v11 = vmax.f32 %v2214_v24, 0.0  ;;  %v2243_v59 = vmax.f32 %v2211_v1, 0.0 }
 0x732   :  { %2282 = vmatpush.msrb.mxu2 %v2253_v39  ;;  %v2276_v39 = vld [vmem:[%s3998_s4 + $0x10] sm:$0xff] }
 0x733   :  { %v1947_v27 = vpop.f32.mrf.mxu0 }
 0x734   :  { %2283 = vmatpush.msrb.mxu2 %v2252_v8  ;;  %v3931_v19 = vadd.f32 %v2161_v15, %v1947_v27  ;;  %v2212_v15 = vadd.f32 %v3907_v28, %v2117_v2  ;;  %v2176_v41 = vpop.f32.mrf.mxu1 }
 0x736   :  { %2284 = vmatpush.msrb.mxu2 %v2251_v7  ;;  %v2244_v5 = vmax.f32 %v2212_v15, 0.0 }
 0x738   :  { %2285 = vmatpush.msrb.mxu2 %v2250_v9 }
 0x73a   :  { %2286 = vmatpush.msrb.mxu2 %v2249_v20 }
 0x73b   :  { %v1950_v6 = vpop.f32.mrf.mxu0 }
 0x73c   :  { %2287 = vmatpush.msrb.mxu2 %v2248_v48  ;;  %v3945_v42 = vadd.f32 %v2164_v14, %v1950_v6  ;;  %v2179_v3 = vpop.f32.mrf.mxu1 }
 0x73e   :  { %2288 = vmatpush.msrb.mxu2 %v2247_v50 }
 0x740   :  { %2289 = vmatpush.msrb.mxu2 %v2246_v11 }
 0x742   :  { %2290 = vmatpush.msrb.mxu2 %v2245_v10 }
 0x743   :  { %v1953_v56 = vpop.f32.mrf.mxu0 }
 0x744   :  { %2291 = vmatpush.msrb.mxu2 %v2244_v5  ;;  %v3952_v14 = vadd.f32 %v2167_v46, %v1953_v56  ;;  %v2182_v53 = vpop.f32.mrf.mxu1 }
 0x746   :  { %2292 = vmatpush.msrb.mxu2 %v2243_v59 }
 0x748   :  { %2293 = vmatpush.msrb.mxu2 %v2242_v18  ;;  %v2229_v18 = vadd.f32 %v3907_v28, %v3952_v14 }
 0x749   :  { %2294 = vmatmul.f32.vlgmr.msrb.gmra.mxu2 %v2274_v29 }
 0x74b   :  { %v1956_v36 = vpop.f32.mrf.mxu0 }
 0x74c   :  { %v3954_v63 = vadd.f32 %v2170_v23, %v1956_v36  ;;  %v2185_v49 = vpop.f32.mrf.mxu1  ;;  %v2228_v36 = vadd.f32 %v3907_v28, %v3945_v42  ;;  %v2275_v42 = vld [vmem:[%s3998_s4 + $0x8] sm:$0xff] }
 0x74e   :  { %v2230_v59 = vadd.f32 %v3907_v28, %v3954_v63  ;;  %v2226_v63 = vadd.f32 %v3907_v28, %v3918_v22 }
 0x750   :  { %v2258_v14 = vmax.f32 %v2226_v63, 0.0 }
 0x751   :  { %2297 = vmatmul.f32.gmra.mxu2 %v2276_v39 }
 0x753   :  { %v1959_v55 = vpop.f32.mrf.mxu0 }
 0x754   :  { %v2174_v30 = vadd.f32 %v2173_v12, %v1959_v55  ;;  %v2188_v45 = vpop.f32.mrf.mxu1  ;;  %v2227_v55 = vadd.f32 %v3907_v28, %v3931_v19  ;;  %v2277_v19 = vld [vmem:[%s3998_s4 + $0x18] sm:$0xff]  ;;  %s2564_s4 = smov 128  }
 0x756   :  { %v2231_v34 = vadd.f32 %v3907_v28, %v2174_v30  ;;  %v2261_v30 = vmax.f32 %v2229_v18, 0.0 }
 0x75b   :  { %v1962_v57 = vpop.f32.mrf.mxu0 }
 0x75c   :  { %v2177_v0 = vadd.f32 %v2176_v41, %v1962_v57  ;;  %v2191_v47 = vpop.f32.mrf.mxu1  ;;  %v2263_v41 = vmax.f32 %v2231_v34, 0.0  ;;  %v2260_v57 = vmax.f32 %v2228_v36, 0.0 }
 0x75e   :  { %v2232_v1 = vadd.f32 %v3907_v28, %v2177_v0 }
 0x760   :  { %v2264_v56 = vmax.f32 %v2232_v1, 0.0 }
 0x763   :  { %v1965_v40 = vpop.f32.mrf.mxu0 }
 0x764   :  { %v2180_v21 = vadd.f32 %v2179_v3, %v1965_v40  ;;  %v2194_v52 = vpop.f32.mrf.mxu1  ;;  %v2262_v3 = vmax.f32 %v2230_v59, 0.0 }
 0x766   :  { %v2233_v11 = vadd.f32 %v3907_v28, %v2180_v21 }
 0x768   :  { %v2265_v5 = vmax.f32 %v2233_v11, 0.0 }
 0x76b   :  { %v1968_v54 = vpop.f32.mrf.mxu0 }
 0x76c   :  { %v2183_v13 = vadd.f32 %v2182_v53, %v1968_v54  ;;  %v2197_v25 = vpop.f32.mrf.mxu1  ;;  %v2259_v53 = vmax.f32 %v2227_v55, 0.0 }
 0x76e   :  { %v2234_v16 = vadd.f32 %v3907_v28, %v2183_v13 }
 0x770   :  { %v2266_v10 = vmax.f32 %v2234_v16, 0.0 }
 0x773   :  { %v1971_v58 = vpop.f32.mrf.mxu0 }
 0x774   :  { %v2200_v61 = vpop.f32.mrf.mxu1  ;;  %v2186_v2 = vadd.f32 %v2185_v49, %v1971_v58 }
 0x776   :  { %v2235_v50 = vadd.f32 %v3907_v28, %v2186_v2 }
 0x778   :  { %v2267_v12 = vmax.f32 %v2235_v50, 0.0 }
 0x77b   :  { %v1974_v46 = vpop.f32.mrf.mxu0 }
 0x77c   :  { %v2203_v17 = vpop.f32.mrf.mxu1  ;;  %v2189_v51 = vadd.f32 %v2188_v45, %v1974_v46 }
 0x77e   :  { %v2236_v32 = vadd.f32 %v3907_v28, %v2189_v51 }
 0x780   :  { %v2268_v15 = vmax.f32 %v2236_v32, 0.0 }
 0x783   :  { %v1977_v38 = vpop.f32.mrf.mxu0 }
 0x784   :  { %v2192_v37 = vadd.f32 %v2191_v47, %v1977_v38 }
 0x786   :  { %v2237_v24 = vadd.f32 %v3907_v28, %v2192_v37 }
 0x788   :  { %v2269_v6 = vmax.f32 %v2237_v24, 0.0 }
 0x78b   :  { %v1980_v60 = vpop.f32.mrf.mxu0 }
 0x78c   :  { %v2195_v7 = vadd.f32 %v2194_v52, %v1980_v60 }
 0x78e   :  { %v2238_v4 = vadd.f32 %v3907_v28, %v2195_v7 }
 0x790   :  { %v2270_v33 = vmax.f32 %v2238_v4, 0.0 }
 0x793   :  { %v1983_v44 = vpop.f32.mrf.mxu0 }
 0x794   :  { %v2198_v35 = vadd.f32 %v2197_v25, %v1983_v44 }
 0x796   :  { %v2239_v31 = vadd.f32 %v3907_v28, %v2198_v35 }
 0x798   :  { %v2271_v48 = vmax.f32 %v2239_v31, 0.0 }
 0x79b   :  { %v1986_v43 = vpop.f32.mrf.mxu0 }
 0x79c   :  { %v2201_v62 = vadd.f32 %v2200_v61, %v1986_v43 }
 0x79e   :  { %v2240_v27 = vadd.f32 %v3907_v28, %v2201_v62 }
 0x7a0   :  { %v2272_v20 = vmax.f32 %v2240_v27, 0.0 }
 0x7a3   :  { %v1989_v8 = vpop.f32.mrf.mxu0 }
 0x7a4   :  { %v2204_v26 = vadd.f32 %v2203_v17, %v1989_v8 }
 0x7a6   :  { %v2241_v23 = vadd.f32 %v3907_v28, %v2204_v26 }
 0x7a8   :  { %v2273_v9 = vmax.f32 %v2241_v23, 0.0 }
 0x7aa   :  { %2301 = vmatpush.msra.mxu2 %v2273_v9 }
 0x7ac   :  { %2302 = vmatpush.msra.mxu2 %v2272_v20 }
 0x7ae   :  { %2303 = vmatpush.msra.mxu2 %v2271_v48 }
 0x7b0   :  { %2304 = vmatpush.msra.mxu2 %v2270_v33 }
 0x7b2   :  { %2305 = vmatpush.msra.mxu2 %v2269_v6 }
 0x7b4   :  { %2306 = vmatpush.msra.mxu2 %v2268_v15 }
 0x7b6   :  { %2307 = vmatpush.msra.mxu2 %v2267_v12 }
 0x7b8   :  { %2308 = vmatpush.msra.mxu2 %v2266_v10 }
 0x7ba   :  { %2309 = vmatpush.msra.mxu2 %v2265_v5 }
 0x7bc   :  { %2310 = vmatpush.msra.mxu2 %v2264_v56 }
 0x7be   :  { %2311 = vmatpush.msra.mxu2 %v2263_v41 }
 0x7c0   :  { %2312 = vmatpush.msra.mxu2 %v2262_v3 }
 0x7c2   :  { %2313 = vmatpush.msra.mxu2 %v2261_v30 }
 0x7c4   :  { %2314 = vmatpush.msra.mxu2 %v2260_v57 }
 0x7c6   :  { %2315 = vmatpush.msra.mxu2 %v2259_v53 }
 0x7c8   :  { %2316 = vmatpush.msra.mxu2 %v2258_v14 }
 0x7c9   :  { %2317 = vmatmul.f32.vlgmr.msra.gmra.mxu2 %v2275_v42 }
 0x7cc   :  { %v2295_v0 = vpop.f32.mrf.mxu2 }
 0x7d1   :  { %2320 = vmatmul.f32.gmra.mxu2 %v2277_v19 }
 0x7d4   :  { %v2298_v40 = vpop.f32.mrf.mxu2 }
 0x84c   :  { %v2318_v28 = vpop.f32.mrf.mxu2 }
 0x84d   :  { %v2319_v22 = vadd.f32 %v2318_v28, %v2295_v0 }
 0x84f   :  { %2324 = vst.msk [vmem:[#allocation2] sm:$0xff] %vm647_vm2, %v2319_v22 }
 0x854   :  { %v2321_v21 = vpop.f32.mrf.mxu2 }
 0x855   :  { %v2322_v49 = vadd.f32 %v2321_v21, %v2298_v40 }
 0x857   :  { %2325 = vst.msk [vmem:[#allocation2 + $0x8] sm:$0xff] %vm647_vm2, %v2322_v49 }
 0x858   :  { %2338 = dma.vmem_to_hbm [thread:$0]  %s2331_s12, 256, %s2333_s14, [#allocation3], %s2564_s4, %s2564_s4, %s2565_s15  }
 0x859   :  { %2561 = dma.done.wait [#allocation3], 256  }
 0x85a   :  { %2562 = vsyncadd [#allocation3], 4294967040 }
 0x85b   :  { %2343 = vsyncpa [#allocation3], 1 }

</bundles_post_ra>
